<compile_context>
chip_gen: v6e
topology: v6e:2x2x1
jax: 0.10.0
libtpu: 0.0.40
codegen_flags: <defaults>
</compile_context>

<pallas_src>
import functools
import math

import jax
import jax.numpy as jnp
from jax.experimental import pallas as pl
from jax.experimental.pallas import tpu as pltpu


# ----------------------------- configuration --------------------------------
class Config:
    seq_len = 32
    window_size = 8
    window_stride = 4
    enc_in = 4           # number of input variables (channels)
    n_heads = 2
    e_layers = 2
    c_out = 3
    dropout = 0.1        # inference -> identity
    activation = "gelu"
    pool = "mean"


# ------------------------------ small helpers -------------------------------
def _softmax_last(x):
    x = x - jnp.max(x, axis=-1, keepdims=True)
    e = jnp.exp(x)
    return e / jnp.sum(e, axis=-1, keepdims=True)


def _layer_norm(x, g, b, eps=1e-5):
    mu = jnp.mean(x, axis=-1, keepdims=True)
    var = jnp.mean(jnp.square(x - mu), axis=-1, keepdims=True)
    return (x - mu) * jax.lax.rsqrt(var + eps) * g + b


def _act(x, activation):
    if activation == "gelu":
        # TODO(synk): torch.nn.GELU defaults to the exact erf form; the tanh
        # approximation is used here (max abs diff ~1e-3) for robust Mosaic lowering.
        return jax.nn.gelu(x, approximate=True)
    return jnp.maximum(x, 0.0)


def _full_spec(a):
    """BlockSpec covering the entire (small) array, constant across the grid."""
    zeros = (0,) * a.ndim
    return pl.BlockSpec(a.shape, lambda *_: zeros)


def dft_matrix_T(W):
    """Transposed real-DFT matrix: win(rows, W) @ dftT(W, 2W) == cat[fft.real, fft.imag]."""
    n = jnp.arange(W, dtype=jnp.float32)
    k = jnp.arange(W, dtype=jnp.float32)
    ang = 2.0 * jnp.pi * jnp.outer(k, n) / W
    dft = jnp.concatenate([jnp.cos(ang), -jnp.sin(ang)], axis=0)   # (2W, W)
    return dft.T                                                   # (W, 2W)


# ------------------------------ fused Pallas kernel --------------------------
def fused_forward_kernel(x_ref, win_w_ref, win_b_ref, mask_ref, pool_ref, cls_ref,
                         e_wqkv_ref, e_battn_ref, e_wo_ref, e_vec_ref,
                         e_w1_ref, e_b1_ref, e_w2_ref,
                         proj_w_ref, proj_b_ref, out_ref,
                         *, W, stride, WN, n_heads, e_layers, activation, pool):
    """Whole forward for one batch element.

    x_ref:     (1, L, C)                     out_ref: (1, 1, c_out)
    win_w_ref: (4W, 2W)  rows = [dftT ; dftT@Wq ; dftT@Wk ; dftT@Wv]
    win_b_ref: (4, 2W)   rows = [bq ; bk ; bv ; gamma*ones]
    mask_ref:  (WN*C, WN*C) additive block-diagonal mask (0 / -1e30)
    pool_ref:  (WN, WN*C)   per-window mean-over-variables matrix
    e_wqkv_ref:(e_layers, 3*H, d, hd)  per-head column-split Wq/Wk/Wv
    e_battn_ref:(e_layers, H, 3, hd)   per-head bq/bk/bv
    e_wo_ref:  (e_layers, H, hd, d)    per-head row-split Wo
    e_vec_ref: (e_layers, 6, d)        rows = [bo ; b2 ; g1 ; be1 ; g2 ; be2]
    """
    d = 2 * W
    hd = d // n_heads
    S = WN + 1

    # ---- windowing + real DFT + SAGAN attention over variables (batched) ------------
    x0 = x_ref[0]                                                      # (L, C)
    winT = jnp.concatenate(
        [x0[t * stride:t * stride + W, :] for t in range(WN)], axis=1)  # (W, WN*C)
    win2d = winT.T                                                     # (WN*C, W)

    ww = win_w_ref[...]                                                # (4W, d)
    wb = win_b_ref[...]                                                # (4, d)
    xf = jnp.dot(win2d, ww[0 * W:1 * W, :], preferred_element_type=jnp.float32)
    q = jnp.dot(win2d, ww[1 * W:2 * W, :], preferred_element_type=jnp.float32) + wb[0:1, :]
    k = jnp.dot(win2d, ww[2 * W:3 * W, :], preferred_element_type=jnp.float32) + wb[1:2, :]
    v = jnp.dot(win2d, ww[3 * W:4 * W, :], preferred_element_type=jnp.float32) + wb[2:3, :]

    energy = jnp.einsum("io,jo->ij", q, k, preferred_element_type=jnp.float32)
    energy = energy + mask_ref[...]                                    # block-diag mask
    attn = _softmax_last(energy)
    sa = jnp.dot(attn, v, preferred_element_type=jnp.float32)          # (WN*C, d)
    res = wb[3:4, :] * sa + xf                                         # gamma residual
    feats = jnp.dot(pool_ref[...], res, preferred_element_type=jnp.float32)  # (WN, d)

    # ---- cls token + post-norm transformer encoder -----------------------------------
    h = jnp.concatenate([cls_ref[...], feats], axis=0)                 # (S, d)
    scale = 1.0 / math.sqrt(hd)
    for l in range(e_layers):
        vec = e_vec_ref[l]                                             # (6, d)
        attn_out = jnp.zeros((S, d), jnp.float32)
        for hh in range(n_heads):
            bb = e_battn_ref[l, hh]                                    # (3, hd)
            qh = jnp.dot(h, e_wqkv_ref[l, 3 * hh + 0],
                         preferred_element_type=jnp.float32) + bb[0:1, :]
            kh = jnp.dot(h, e_wqkv_ref[l, 3 * hh + 1],
                         preferred_element_type=jnp.float32) + bb[1:2, :]
            vh = jnp.dot(h, e_wqkv_ref[l, 3 * hh + 2],
                         preferred_element_type=jnp.float32) + bb[2:3, :]
            s = jnp.einsum("qd,kd->qk", qh, kh,
                           preferred_element_type=jnp.float32) * scale
            p = _softmax_last(s)
            ch = jnp.dot(p, vh, preferred_element_type=jnp.float32)    # (S, hd)
            attn_out = attn_out + jnp.dot(ch, e_wo_ref[l, hh],
                                          preferred_element_type=jnp.float32)
        attn_out = attn_out + vec[0:1, :]
        y = _layer_norm(h + attn_out, vec[2:3, :], vec[3:4, :])
        h1 = jnp.dot(y, e_w1_ref[l], preferred_element_type=jnp.float32) + e_b1_ref[l]
        h1 = _act(h1, activation)
        ff = jnp.dot(h1, e_w2_ref[l], preferred_element_type=jnp.float32) + vec[1:2, :]
        h = _layer_norm(y + ff, vec[4:5, :], vec[5:6, :])

    # ---- pool + projection ------------------------------------------------------------
    pooled = jnp.mean(h, axis=0, keepdims=True) if pool == "mean" else h[0:1, :]
    out_ref[0] = (jnp.dot(pooled, proj_w_ref[...], preferred_element_type=jnp.float32)
                  + proj_b_ref[...])


# ------------------------------ parameter packing ----------------------------
def pack_params(params, cfg):
    """Host-side repacking: fuse DFT into q/k/v, split encoder heads, stack layers."""
    W = cfg.window_size
    d = 2 * W
    C = cfg.enc_in
    stride = cfg.window_stride
    WN = (cfg.seq_len - W) // stride + 1
    H = cfg.n_heads
    hd = d // H

    dftT = dft_matrix_T(W)                                             # (W, d)
    win_w = jnp.concatenate(
        [dftT, dftT @ params["attn_wq"], dftT @ params["attn_wk"],
         dftT @ params["attn_wv"]], axis=0).astype(jnp.float32)        # (4W, d)
    win_b = jnp.concatenate(
        [params["attn_bq"], params["attn_bk"], params["attn_bv"],
         jnp.broadcast_to(params["attn_gamma"], (1, d))],
        axis=0).astype(jnp.float32)                                    # (4, d)

    win_id = jnp.arange(WN * C, dtype=jnp.int32) // C
    mask_bias = jnp.where(win_id[:, None] == win_id[None, :],
                          0.0, -1e30).astype(jnp.float32)              # (WN*C, WN*C)
    pool_mat = (jnp.arange(WN, dtype=jnp.int32)[:, None] == win_id[None, :]
                ).astype(jnp.float32) / float(C)                       # (WN, WN*C)

    layers = params["layers"]
    e_wqkv = jnp.stack([
        jnp.stack([lp[nm][:, h * hd:(h + 1) * hd]
                   for h in range(H) for nm in ("wq", "wk", "wv")], axis=0)
        for lp in layers], axis=0)                                     # (L, 3H, d, hd)
    e_battn = jnp.stack([
        jnp.stack([jnp.stack([lp[nm][0, h * hd:(h + 1) * hd]
                              for nm in ("bq", "bk", "bv")], axis=0)
                   for h in range(H)], axis=0)
        for lp in layers], axis=0)                                     # (L, H, 3, hd)
    e_wo = jnp.stack([
        jnp.stack([lp["wo"][h * hd:(h + 1) * hd, :] for h in range(H)], axis=0)
        for lp in layers], axis=0)                                     # (L, H, hd, d)
    e_vec = jnp.stack([
        jnp.concatenate([lp["bo"], lp["b2"], lp["g1"], lp["be1"], lp["g2"], lp["be2"]],
                        axis=0)
        for lp in layers], axis=0)                                     # (L, 6, d)
    e_w1 = jnp.stack([lp["w1"] for lp in layers], axis=0)              # (L, d, dff)
    e_b1 = jnp.stack([lp["b1"] for lp in layers], axis=0)              # (L, 1, dff)
    e_w2 = jnp.stack([lp["w2"] for lp in layers], axis=0)              # (L, dff, d)

    return dict(
        win_w=win_w, win_b=win_b, mask_bias=mask_bias, pool_mat=pool_mat,
        cls_token=params["cls_token"][0].astype(jnp.float32),          # (1, d)
        e_wqkv=e_wqkv, e_battn=e_battn, e_wo=e_wo, e_vec=e_vec,
        e_w1=e_w1, e_b1=e_b1, e_w2=e_w2,
        proj_w=params["proj_w"], proj_b=params["proj_b"],
    )


# ------------------------------ pallas_call wrapper ---------------------------
def forward(x, packed, cfg):
    B, L, C = x.shape
    W, stride = cfg.window_size, cfg.window_stride
    WN = (L - W) // stride + 1

    weights = [packed["win_w"], packed["win_b"], packed["mask_bias"], packed["pool_mat"],
               packed["cls_token"], packed["e_wqkv"], packed["e_battn"], packed["e_wo"],
               packed["e_vec"], packed["e_w1"], packed["e_b1"], packed["e_w2"],
               packed["proj_w"], packed["proj_b"]]

    kernel = functools.partial(
        fused_forward_kernel, W=W, stride=stride, WN=WN,
        n_heads=cfg.n_heads, e_layers=cfg.e_layers,
        activation=cfg.activation, pool=cfg.pool)

    out3 = pl.pallas_call(
        kernel,
        out_shape=jax.ShapeDtypeStruct((B, 1, cfg.c_out), jnp.float32),
        grid=(B,),
        in_specs=[pl.BlockSpec((1, L, C), lambda b: (b, 0, 0))]
                 + [_full_spec(w) for w in weights],
        out_specs=pl.BlockSpec((1, 1, cfg.c_out), lambda b: (b, 0, 0)),
        compiler_params=pltpu.CompilerParams(dimension_semantics=("parallel",)),
    )(x, *weights)
    return out3[:, 0, :]                                               # (B, c_out)


# ------------------------------ parameters ------------------------------------
def init_params(cfg, key):
    W = cfg.window_size
    d = 2 * W
    keys = jax.random.split(key, 8 + cfg.e_layers)

    def rnd(k, shape, scale=0.1):
        return scale * jax.random.normal(k, shape, dtype=jnp.float32)

    params = {
        "cls_token": jax.random.normal(keys[0], (1, 1, d), dtype=jnp.float32),
        "attn_wq": rnd(keys[1], (d, d)),
        "attn_wk": rnd(keys[2], (d, d)),
        "attn_wv": rnd(keys[3], (d, d)),
        "attn_bq": rnd(keys[4], (1, d)),
        "attn_bk": rnd(keys[5], (1, d)),
        "attn_bv": rnd(keys[6], (1, d)),
        # SAGAN gamma is a learnable parameter initialised to 0 (matches torch init).
        "attn_gamma": jnp.zeros((1, 1), dtype=jnp.float32),
        "proj_w": rnd(keys[7], (d, cfg.c_out)),
        "proj_b": jnp.zeros((1, cfg.c_out), dtype=jnp.float32),
        "layers": [],
    }
    dff = 4 * d
    for l in range(cfg.e_layers):
        lk = jax.random.split(keys[8 + l], 8)
        params["layers"].append({
            "wq": rnd(lk[0], (d, d)), "bq": jnp.zeros((1, d), jnp.float32),
            "wk": rnd(lk[1], (d, d)), "bk": jnp.zeros((1, d), jnp.float32),
            "wv": rnd(lk[2], (d, d)), "bv": jnp.zeros((1, d), jnp.float32),
            "wo": rnd(lk[3], (d, d)), "bo": jnp.zeros((1, d), jnp.float32),
            "w1": rnd(lk[4], (d, dff)), "b1": jnp.zeros((1, dff), jnp.float32),
            "w2": rnd(lk[5], (dff, d)), "b2": jnp.zeros((1, d), jnp.float32),
            "g1": jnp.ones((1, d), jnp.float32), "be1": jnp.zeros((1, d), jnp.float32),
            "g2": jnp.ones((1, d), jnp.float32), "be2": jnp.zeros((1, d), jnp.float32),
        })
    return params


# ------------------------------ pure-JAX reference -----------------------------
def reference_forward(x, params, cfg):
    B, L, _ = x.shape
    W, stride = cfg.window_size, cfg.window_stride
    WN = (L - W) // stride + 1
    d = 2 * W
    windows = jnp.stack([x[:, stride * t:stride * t + W, :] for t in range(WN)], axis=1)
    win_t = jnp.transpose(windows, (0, 1, 3, 2))                # (B, WN, C, W)
    xf = jnp.einsum("btcw,wk->btck", win_t, dft_matrix_T(W))
    q = xf @ params["attn_wq"] + params["attn_bq"]
    k = xf @ params["attn_wk"] + params["attn_bk"]
    v = xf @ params["attn_wv"] + params["attn_bv"]
    energy = jnp.einsum("btio,btjo->btij", q, k)
    a = jax.nn.softmax(energy, axis=-1)
    out = jnp.einsum("btij,btjo->btio", a, v)
    res = params["attn_gamma"][0, 0] * out + xf
    feats = jnp.mean(res, axis=2)
    cls = jnp.broadcast_to(params["cls_token"], (B, 1, d))
    h = jnp.concatenate([cls, feats], axis=1)
    hd = d // cfg.n_heads
    for lp in params["layers"]:
        qh = (h @ lp["wq"] + lp["bq"]).reshape(B, -1, cfg.n_heads, hd).transpose(0, 2, 1, 3)
        kh = (h @ lp["wk"] + lp["bk"]).reshape(B, -1, cfg.n_heads, hd).transpose(0, 2, 1, 3)
        vh = (h @ lp["wv"] + lp["bv"]).reshape(B, -1, cfg.n_heads, hd).transpose(0, 2, 1, 3)
        s = jnp.einsum("bhqd,bhkd->bhqk", qh, kh) / math.sqrt(hd)
        p = jax.nn.softmax(s, axis=-1)
        ctx = jnp.einsum("bhqk,bhkd->bhqd", p, vh).transpose(0, 2, 1, 3).reshape(B, -1, d)
        y = _layer_norm(h + ctx @ lp["wo"] + lp["bo"], lp["g1"], lp["be1"])
        h1 = y @ lp["w1"] + lp["b1"]
        h1 = jax.nn.gelu(h1, approximate=True) if cfg.activation == "gelu" else jnp.maximum(h1, 0.0)
        h = _layer_norm(y + h1 @ lp["w2"] + lp["b2"], lp["g2"], lp["be2"])
    pooled = h.mean(axis=1) if cfg.pool == "mean" else h[:, 0]
    return pooled @ params["proj_w"] + params["proj_b"]


# ------------------------------ main ---------------------------------------------
if __name__ == "__main__":
    cfg = Config()
    key = jax.random.PRNGKey(0)
    kx, kp = jax.random.split(key)
    x = jax.random.normal(kx, (2, cfg.seq_len, cfg.enc_in), dtype=jnp.float32)
    params = init_params(cfg, kp)

    fwd = jax.jit(functools.partial(forward, cfg=cfg))

    # Check 1: faithful init (gamma = 0, exactly as torch's SelfAttention initialises it).
    packed = pack_params(params, cfg)
    out = jax.block_until_ready(fwd(x, packed))
    assert out.shape == (2, cfg.c_out)
    ref = reference_forward(x, params, cfg)
    err = float(jnp.max(jnp.abs(out - ref)))
    assert err < 1e-3, f"mismatch vs JAX reference (gamma=0): {err}"

    # Check 2: non-zero gamma so the SAGAN window-attention path is exercised numerically.
    params2 = dict(params)
    params2["attn_gamma"] = jnp.full((1, 1), 0.5, dtype=jnp.float32)
    packed2 = pack_params(params2, cfg)
    out2 = jax.block_until_ready(fwd(x, packed2))
    ref2 = reference_forward(x, params2, cfg)
    err2 = float(jnp.max(jnp.abs(out2 - ref2)))
    assert err2 < 1e-3, f"mismatch vs JAX reference (gamma=0.5): {err2}"

    print("KERNEL_OK")
</pallas_src>

<mosaic_0001>
module attributes {stable_mosaic.version = 11 : i64} {
  func.func @fused_forward_kernel(%arg0: i32, %arg1: memref<1x32x4xf32, #tpu.memory_space<vmem>>, %arg2: memref<32x16xf32, #tpu.memory_space<vmem>>, %arg3: memref<4x16xf32, #tpu.memory_space<vmem>>, %arg4: memref<28x28xf32, #tpu.memory_space<vmem>>, %arg5: memref<7x28xf32, #tpu.memory_space<vmem>>, %arg6: memref<1x16xf32, #tpu.memory_space<vmem>>, %arg7: memref<2x6x16x8xf32, #tpu.memory_space<vmem>>, %arg8: memref<2x2x3x8xf32, #tpu.memory_space<vmem>>, %arg9: memref<2x2x8x16xf32, #tpu.memory_space<vmem>>, %arg10: memref<2x6x16xf32, #tpu.memory_space<vmem>>, %arg11: memref<2x16x64xf32, #tpu.memory_space<vmem>>, %arg12: memref<2x1x64xf32, #tpu.memory_space<vmem>>, %arg13: memref<2x64x16xf32, #tpu.memory_space<vmem>>, %arg14: memref<16x3xf32, #tpu.memory_space<vmem>>, %arg15: memref<1x3xf32, #tpu.memory_space<vmem>>, %arg16: memref<1x1x3xf32, #tpu.memory_space<vmem>>) attributes {dimension_semantics = [#tpu.dimension_semantics<parallel>], iteration_bounds = array<i64: 2>, scalar_prefetch = 0 : i64, scratch_operands = 0 : i64, tpu.core_type = #tpu.core_type<tc>, window_params = [{transform_indices = @transform_0, window_bounds = array<i64: 1, 32, 4>}, {pipeline_mode = #tpu.pipeline_mode<synchronous>, transform_indices = @transform_1, window_bounds = array<i64: 32, 16>}, {pipeline_mode = #tpu.pipeline_mode<synchronous>, transform_indices = @transform_2, window_bounds = array<i64: 4, 16>}, {pipeline_mode = #tpu.pipeline_mode<synchronous>, transform_indices = @transform_3, window_bounds = array<i64: 28, 28>}, {pipeline_mode = #tpu.pipeline_mode<synchronous>, transform_indices = @transform_4, window_bounds = array<i64: 7, 28>}, {pipeline_mode = #tpu.pipeline_mode<synchronous>, transform_indices = @transform_5, window_bounds = array<i64: 1, 16>}, {pipeline_mode = #tpu.pipeline_mode<synchronous>, transform_indices = @transform_6, window_bounds = array<i64: 2, 6, 16, 8>}, {pipeline_mode = #tpu.pipeline_mode<synchronous>, transform_indices = @transform_7, window_bounds = array<i64: 2, 2, 3, 8>}, {pipeline_mode = #tpu.pipeline_mode<synchronous>, transform_indices = @transform_8, window_bounds = array<i64: 2, 2, 8, 16>}, {pipeline_mode = #tpu.pipeline_mode<synchronous>, transform_indices = @transform_9, window_bounds = array<i64: 2, 6, 16>}, {pipeline_mode = #tpu.pipeline_mode<synchronous>, transform_indices = @transform_10, window_bounds = array<i64: 2, 16, 64>}, {pipeline_mode = #tpu.pipeline_mode<synchronous>, transform_indices = @transform_11, window_bounds = array<i64: 2, 1, 64>}, {pipeline_mode = #tpu.pipeline_mode<synchronous>, transform_indices = @transform_12, window_bounds = array<i64: 2, 64, 16>}, {pipeline_mode = #tpu.pipeline_mode<synchronous>, transform_indices = @transform_13, window_bounds = array<i64: 16, 3>}, {pipeline_mode = #tpu.pipeline_mode<synchronous>, transform_indices = @transform_14, window_bounds = array<i64: 1, 3>}, {transform_indices = @transform_15, window_bounds = array<i64: 1, 1, 3>}]} {
    %c0 = arith.constant 0 : index
    %c0_0 = arith.constant 0 : index
    %c0_1 = arith.constant 0 : index
    %0 = vector.load %arg1[%c0, %c0_0, %c0_1] : memref<1x32x4xf32, #tpu.memory_space<vmem>>, vector<1x32x4xf32>
    %1 = vector.shape_cast %0 : vector<1x32x4xf32> to vector<32x4xf32>
    %2 = vector.extract_strided_slice %1 {offsets = [0, 0], sizes = [8, 4], strides = [1, 1]} : vector<32x4xf32> to vector<8x4xf32>
    %3 = vector.extract_strided_slice %1 {offsets = [4, 0], sizes = [8, 4], strides = [1, 1]} : vector<32x4xf32> to vector<8x4xf32>
    %4 = vector.extract_strided_slice %1 {offsets = [8, 0], sizes = [8, 4], strides = [1, 1]} : vector<32x4xf32> to vector<8x4xf32>
    %5 = vector.extract_strided_slice %1 {offsets = [12, 0], sizes = [8, 4], strides = [1, 1]} : vector<32x4xf32> to vector<8x4xf32>
    %6 = vector.extract_strided_slice %1 {offsets = [16, 0], sizes = [8, 4], strides = [1, 1]} : vector<32x4xf32> to vector<8x4xf32>
    %7 = vector.extract_strided_slice %1 {offsets = [20, 0], sizes = [8, 4], strides = [1, 1]} : vector<32x4xf32> to vector<8x4xf32>
    %8 = vector.extract_strided_slice %1 {offsets = [24, 0], sizes = [8, 4], strides = [1, 1]} : vector<32x4xf32> to vector<8x4xf32>
    %9 = tpu.concatenate %2, %3, %4, %5, %6, %7, %8 in 1 : vector<8x4xf32>, vector<8x4xf32>, vector<8x4xf32>, vector<8x4xf32>, vector<8x4xf32>, vector<8x4xf32>, vector<8x4xf32> -> vector<8x28xf32>
    %10 = tpu.transpose %9, [1, 0] : vector<8x28xf32> -> vector<28x8xf32>
    %c0_2 = arith.constant 0 : index
    %c0_3 = arith.constant 0 : index
    %11 = vector.load %arg2[%c0_2, %c0_3] : memref<32x16xf32, #tpu.memory_space<vmem>>, vector<32x16xf32>
    %c0_4 = arith.constant 0 : index
    %c0_5 = arith.constant 0 : index
    %12 = vector.load %arg3[%c0_4, %c0_5] : memref<4x16xf32, #tpu.memory_space<vmem>>, vector<4x16xf32>
    %13 = vector.extract_strided_slice %11 {offsets = [0, 0], sizes = [8, 16], strides = [1, 1]} : vector<32x16xf32> to vector<8x16xf32>
    %cst = arith.constant dense<0.000000e+00> : vector<28x16xf32>
    %14 = tpu.matmul %10, %13, %cst {dimension_numbers = #tpu.dot_dimension_numbers<[1], [0], [0], [1], [0, 0, 1, 1], [], []>} : vector<28x8xf32>, vector<8x16xf32>, vector<28x16xf32> -> vector<28x16xf32>
    %15 = vector.extract_strided_slice %11 {offsets = [8, 0], sizes = [8, 16], strides = [1, 1]} : vector<32x16xf32> to vector<8x16xf32>
    %cst_6 = arith.constant dense<0.000000e+00> : vector<28x16xf32>
    %16 = tpu.matmul %10, %15, %cst_6 {dimension_numbers = #tpu.dot_dimension_numbers<[1], [0], [0], [1], [0, 0, 1, 1], [], []>} : vector<28x8xf32>, vector<8x16xf32>, vector<28x16xf32> -> vector<28x16xf32>
    %17 = vector.extract_strided_slice %12 {offsets = [0, 0], sizes = [1, 16], strides = [1, 1]} : vector<4x16xf32> to vector<1x16xf32>
    %18 = vector.broadcast %17 : vector<1x16xf32> to vector<28x16xf32>
    %19 = arith.addf %16, %18 : vector<28x16xf32>
    %20 = vector.extract_strided_slice %11 {offsets = [16, 0], sizes = [8, 16], strides = [1, 1]} : vector<32x16xf32> to vector<8x16xf32>
    %cst_7 = arith.constant dense<0.000000e+00> : vector<28x16xf32>
    %21 = tpu.matmul %10, %20, %cst_7 {dimension_numbers = #tpu.dot_dimension_numbers<[1], [0], [0], [1], [0, 0, 1, 1], [], []>} : vector<28x8xf32>, vector<8x16xf32>, vector<28x16xf32> -> vector<28x16xf32>
    %22 = vector.extract_strided_slice %12 {offsets = [1, 0], sizes = [1, 16], strides = [1, 1]} : vector<4x16xf32> to vector<1x16xf32>
    %23 = vector.broadcast %22 : vector<1x16xf32> to vector<28x16xf32>
    %24 = arith.addf %21, %23 : vector<28x16xf32>
    %25 = vector.extract_strided_slice %11 {offsets = [24, 0], sizes = [8, 16], strides = [1, 1]} : vector<32x16xf32> to vector<8x16xf32>
    %cst_8 = arith.constant dense<0.000000e+00> : vector<28x16xf32>
    %26 = tpu.matmul %10, %25, %cst_8 {dimension_numbers = #tpu.dot_dimension_numbers<[1], [0], [0], [1], [0, 0, 1, 1], [], []>} : vector<28x8xf32>, vector<8x16xf32>, vector<28x16xf32> -> vector<28x16xf32>
    %27 = vector.extract_strided_slice %12 {offsets = [2, 0], sizes = [1, 16], strides = [1, 1]} : vector<4x16xf32> to vector<1x16xf32>
    %28 = vector.broadcast %27 : vector<1x16xf32> to vector<28x16xf32>
    %29 = arith.addf %26, %28 : vector<28x16xf32>
    "tpu.trace_start"() <{level = 10 : i32, message = "io,jo->ij"}> : () -> ()
    %cst_9 = arith.constant dense<0.000000e+00> : vector<28x28xf32>
    %30 = tpu.matmul %19, %24, %cst_9 {dimension_numbers = #tpu.dot_dimension_numbers<[1], [1], [0], [0], [0, 0, 1, 0], [], []>} : vector<28x16xf32>, vector<28x16xf32>, vector<28x28xf32> -> vector<28x28xf32>
    "tpu.trace_stop"() : () -> ()
    %c0_10 = arith.constant 0 : index
    %c0_11 = arith.constant 0 : index
    %31 = vector.load %arg4[%c0_10, %c0_11] : memref<28x28xf32, #tpu.memory_space<vmem>>, vector<28x28xf32>
    %32 = arith.addf %30, %31 : vector<28x28xf32>
    %cst_12 = arith.constant dense<0xFF800000> : vector<28xf32>
    %33 = vector.multi_reduction <maximumf>, %32, %cst_12 [1] : vector<28x28xf32> to vector<28xf32>
    %34 = vector.shape_cast %33 : vector<28xf32> to vector<28x1xf32>
    %35 = vector.broadcast %34 : vector<28x1xf32> to vector<28x28xf32>
    %36 = arith.subf %32, %35 : vector<28x28xf32>
    %37 = math.exp %36 : vector<28x28xf32>
    %cst_13 = arith.constant dense<0.000000e+00> : vector<28xf32>
    %38 = vector.multi_reduction <add>, %37, %cst_13 [1] : vector<28x28xf32> to vector<28xf32>
    %39 = vector.shape_cast %38 : vector<28xf32> to vector<28x1xf32>
    %40 = vector.broadcast %39 : vector<28x1xf32> to vector<28x28xf32>
    %41 = arith.divf %37, %40 : vector<28x28xf32>
    %cst_14 = arith.constant dense<0.000000e+00> : vector<28x16xf32>
    %42 = tpu.matmul %41, %29, %cst_14 {dimension_numbers = #tpu.dot_dimension_numbers<[1], [0], [0], [1], [0, 0, 1, 1], [], []>} : vector<28x28xf32>, vector<28x16xf32>, vector<28x16xf32> -> vector<28x16xf32>
    %43 = vector.extract_strided_slice %12 {offsets = [3, 0], sizes = [1, 16], strides = [1, 1]} : vector<4x16xf32> to vector<1x16xf32>
    %44 = vector.broadcast %43 : vector<1x16xf32> to vector<28x16xf32>
    %45 = arith.mulf %44, %42 : vector<28x16xf32>
    %46 = arith.addf %45, %14 : vector<28x16xf32>
    %c0_15 = arith.constant 0 : index
    %c0_16 = arith.constant 0 : index
    %47 = vector.load %arg5[%c0_15, %c0_16] : memref<7x28xf32, #tpu.memory_space<vmem>>, vector<7x28xf32>
    %cst_17 = arith.constant dense<0.000000e+00> : vector<7x16xf32>
    %48 = tpu.matmul %47, %46, %cst_17 {dimension_numbers = #tpu.dot_dimension_numbers<[1], [0], [0], [1], [0, 0, 1, 1], [], []>} : vector<7x28xf32>, vector<28x16xf32>, vector<7x16xf32> -> vector<7x16xf32>
    %c0_18 = arith.constant 0 : index
    %c0_19 = arith.constant 0 : index
    %49 = vector.load %arg6[%c0_18, %c0_19] : memref<1x16xf32, #tpu.memory_space<vmem>>, vector<1x16xf32>
    %50 = tpu.concatenate %49, %48 in 0 : vector<1x16xf32>, vector<7x16xf32> -> vector<8x16xf32>
    %c0_20 = arith.constant 0 : index
    %c0_21 = arith.constant 0 : index
    %c0_22 = arith.constant 0 : index
    %51 = vector.load %arg10[%c0_20, %c0_21, %c0_22] : memref<2x6x16xf32, #tpu.memory_space<vmem>>, vector<1x6x16xf32>
    %52 = vector.shape_cast %51 : vector<1x6x16xf32> to vector<6x16xf32>
    %cst_23 = arith.constant 0.000000e+00 : f32
    %53 = vector.broadcast %cst_23 : f32 to vector<8x16xf32>
    %c0_24 = arith.constant 0 : index
    %c0_25 = arith.constant 0 : index
    %c0_26 = arith.constant 0 : index
    %c0_27 = arith.constant 0 : index
    %54 = vector.load %arg8[%c0_24, %c0_25, %c0_26, %c0_27] : memref<2x2x3x8xf32, #tpu.memory_space<vmem>>, vector<1x1x3x8xf32>
    %55 = vector.shape_cast %54 : vector<1x1x3x8xf32> to vector<3x8xf32>
    %c0_28 = arith.constant 0 : index
    %c0_29 = arith.constant 0 : index
    %c0_30 = arith.constant 0 : index
    %c0_31 = arith.constant 0 : index
    %56 = vector.load %arg7[%c0_28, %c0_29, %c0_30, %c0_31] : memref<2x6x16x8xf32, #tpu.memory_space<vmem>>, vector<1x1x16x8xf32>
    %57 = vector.shape_cast %56 : vector<1x1x16x8xf32> to vector<16x8xf32>
    %cst_32 = arith.constant dense<0.000000e+00> : vector<8x8xf32>
    %58 = tpu.matmul %50, %57, %cst_32 {dimension_numbers = #tpu.dot_dimension_numbers<[1], [0], [0], [1], [0, 0, 1, 1], [], []>} : vector<8x16xf32>, vector<16x8xf32>, vector<8x8xf32> -> vector<8x8xf32>
    %59 = vector.extract_strided_slice %55 {offsets = [0, 0], sizes = [1, 8], strides = [1, 1]} : vector<3x8xf32> to vector<1x8xf32>
    %60 = vector.broadcast %59 : vector<1x8xf32> to vector<8x8xf32>
    %61 = arith.addf %58, %60 : vector<8x8xf32>
    %c0_33 = arith.constant 0 : index
    %c1 = arith.constant 1 : index
    %c0_34 = arith.constant 0 : index
    %c0_35 = arith.constant 0 : index
    %62 = vector.load %arg7[%c0_33, %c1, %c0_34, %c0_35] : memref<2x6x16x8xf32, #tpu.memory_space<vmem>>, vector<1x1x16x8xf32>
    %63 = vector.shape_cast %62 : vector<1x1x16x8xf32> to vector<16x8xf32>
    %cst_36 = arith.constant dense<0.000000e+00> : vector<8x8xf32>
    %64 = tpu.matmul %50, %63, %cst_36 {dimension_numbers = #tpu.dot_dimension_numbers<[1], [0], [0], [1], [0, 0, 1, 1], [], []>} : vector<8x16xf32>, vector<16x8xf32>, vector<8x8xf32> -> vector<8x8xf32>
    %65 = vector.extract_strided_slice %55 {offsets = [1, 0], sizes = [1, 8], strides = [1, 1]} : vector<3x8xf32> to vector<1x8xf32>
    %66 = vector.broadcast %65 : vector<1x8xf32> to vector<8x8xf32>
    %67 = arith.addf %64, %66 : vector<8x8xf32>
    %c0_37 = arith.constant 0 : index
    %c2 = arith.constant 2 : index
    %c0_38 = arith.constant 0 : index
    %c0_39 = arith.constant 0 : index
    %68 = vector.load %arg7[%c0_37, %c2, %c0_38, %c0_39] : memref<2x6x16x8xf32, #tpu.memory_space<vmem>>, vector<1x1x16x8xf32>
    %69 = vector.shape_cast %68 : vector<1x1x16x8xf32> to vector<16x8xf32>
    %cst_40 = arith.constant dense<0.000000e+00> : vector<8x8xf32>
    %70 = tpu.matmul %50, %69, %cst_40 {dimension_numbers = #tpu.dot_dimension_numbers<[1], [0], [0], [1], [0, 0, 1, 1], [], []>} : vector<8x16xf32>, vector<16x8xf32>, vector<8x8xf32> -> vector<8x8xf32>
    %71 = vector.extract_strided_slice %55 {offsets = [2, 0], sizes = [1, 8], strides = [1, 1]} : vector<3x8xf32> to vector<1x8xf32>
    %72 = vector.broadcast %71 : vector<1x8xf32> to vector<8x8xf32>
    %73 = arith.addf %70, %72 : vector<8x8xf32>
    "tpu.trace_start"() <{level = 10 : i32, message = "qd,kd->qk"}> : () -> ()
    %cst_41 = arith.constant dense<0.000000e+00> : vector<8x8xf32>
    %74 = tpu.matmul %61, %67, %cst_41 {dimension_numbers = #tpu.dot_dimension_numbers<[1], [1], [0], [0], [0, 0, 1, 0], [], []>} : vector<8x8xf32>, vector<8x8xf32>, vector<8x8xf32> -> vector<8x8xf32>
    "tpu.trace_stop"() : () -> ()
    %cst_42 = arith.constant 0.353553385 : f32
    %75 = vector.broadcast %cst_42 : f32 to vector<8x8xf32>
    %76 = arith.mulf %74, %75 : vector<8x8xf32>
    %cst_43 = arith.constant dense<0xFF800000> : vector<8xf32>
    %77 = vector.multi_reduction <maximumf>, %76, %cst_43 [1] : vector<8x8xf32> to vector<8xf32>
    %78 = vector.shape_cast %77 : vector<8xf32> to vector<8x1xf32>
    %79 = vector.broadcast %78 : vector<8x1xf32> to vector<8x8xf32>
    %80 = arith.subf %76, %79 : vector<8x8xf32>
    %81 = math.exp %80 : vector<8x8xf32>
    %cst_44 = arith.constant dense<0.000000e+00> : vector<8xf32>
    %82 = vector.multi_reduction <add>, %81, %cst_44 [1] : vector<8x8xf32> to vector<8xf32>
    %83 = vector.shape_cast %82 : vector<8xf32> to vector<8x1xf32>
    %84 = vector.broadcast %83 : vector<8x1xf32> to vector<8x8xf32>
    %85 = arith.divf %81, %84 : vector<8x8xf32>
    %cst_45 = arith.constant dense<0.000000e+00> : vector<8x8xf32>
    %86 = tpu.matmul %85, %73, %cst_45 {dimension_numbers = #tpu.dot_dimension_numbers<[1], [0], [0], [1], [0, 0, 1, 1], [], []>} : vector<8x8xf32>, vector<8x8xf32>, vector<8x8xf32> -> vector<8x8xf32>
    %c0_46 = arith.constant 0 : index
    %c0_47 = arith.constant 0 : index
    %c0_48 = arith.constant 0 : index
    %c0_49 = arith.constant 0 : index
    %87 = vector.load %arg9[%c0_46, %c0_47, %c0_48, %c0_49] : memref<2x2x8x16xf32, #tpu.memory_space<vmem>>, vector<1x1x8x16xf32>
    %88 = vector.shape_cast %87 : vector<1x1x8x16xf32> to vector<8x16xf32>
    %cst_50 = arith.constant dense<0.000000e+00> : vector<8x16xf32>
    %89 = tpu.matmul %86, %88, %cst_50 {dimension_numbers = #tpu.dot_dimension_numbers<[1], [0], [0], [1], [0, 0, 1, 1], [], []>} : vector<8x8xf32>, vector<8x16xf32>, vector<8x16xf32> -> vector<8x16xf32>
    %90 = arith.addf %53, %89 : vector<8x16xf32>
    %c0_51 = arith.constant 0 : index
    %c1_52 = arith.constant 1 : index
    %c0_53 = arith.constant 0 : index
    %c0_54 = arith.constant 0 : index
    %91 = vector.load %arg8[%c0_51, %c1_52, %c0_53, %c0_54] : memref<2x2x3x8xf32, #tpu.memory_space<vmem>>, vector<1x1x3x8xf32>
    %92 = vector.shape_cast %91 : vector<1x1x3x8xf32> to vector<3x8xf32>
    %c0_55 = arith.constant 0 : index
    %c3 = arith.constant 3 : index
    %c0_56 = arith.constant 0 : index
    %c0_57 = arith.constant 0 : index
    %93 = vector.load %arg7[%c0_55, %c3, %c0_56, %c0_57] : memref<2x6x16x8xf32, #tpu.memory_space<vmem>>, vector<1x1x16x8xf32>
    %94 = vector.shape_cast %93 : vector<1x1x16x8xf32> to vector<16x8xf32>
    %cst_58 = arith.constant dense<0.000000e+00> : vector<8x8xf32>
    %95 = tpu.matmul %50, %94, %cst_58 {dimension_numbers = #tpu.dot_dimension_numbers<[1], [0], [0], [1], [0, 0, 1, 1], [], []>} : vector<8x16xf32>, vector<16x8xf32>, vector<8x8xf32> -> vector<8x8xf32>
    %96 = vector.extract_strided_slice %92 {offsets = [0, 0], sizes = [1, 8], strides = [1, 1]} : vector<3x8xf32> to vector<1x8xf32>
    %97 = vector.broadcast %96 : vector<1x8xf32> to vector<8x8xf32>
    %98 = arith.addf %95, %97 : vector<8x8xf32>
    %c0_59 = arith.constant 0 : index
    %c4 = arith.constant 4 : index
    %c0_60 = arith.constant 0 : index
    %c0_61 = arith.constant 0 : index
    %99 = vector.load %arg7[%c0_59, %c4, %c0_60, %c0_61] : memref<2x6x16x8xf32, #tpu.memory_space<vmem>>, vector<1x1x16x8xf32>
    %100 = vector.shape_cast %99 : vector<1x1x16x8xf32> to vector<16x8xf32>
    %cst_62 = arith.constant dense<0.000000e+00> : vector<8x8xf32>
    %101 = tpu.matmul %50, %100, %cst_62 {dimension_numbers = #tpu.dot_dimension_numbers<[1], [0], [0], [1], [0, 0, 1, 1], [], []>} : vector<8x16xf32>, vector<16x8xf32>, vector<8x8xf32> -> vector<8x8xf32>
    %102 = vector.extract_strided_slice %92 {offsets = [1, 0], sizes = [1, 8], strides = [1, 1]} : vector<3x8xf32> to vector<1x8xf32>
    %103 = vector.broadcast %102 : vector<1x8xf32> to vector<8x8xf32>
    %104 = arith.addf %101, %103 : vector<8x8xf32>
    %c0_63 = arith.constant 0 : index
    %c5 = arith.constant 5 : index
    %c0_64 = arith.constant 0 : index
    %c0_65 = arith.constant 0 : index
    %105 = vector.load %arg7[%c0_63, %c5, %c0_64, %c0_65] : memref<2x6x16x8xf32, #tpu.memory_space<vmem>>, vector<1x1x16x8xf32>
    %106 = vector.shape_cast %105 : vector<1x1x16x8xf32> to vector<16x8xf32>
    %cst_66 = arith.constant dense<0.000000e+00> : vector<8x8xf32>
    %107 = tpu.matmul %50, %106, %cst_66 {dimension_numbers = #tpu.dot_dimension_numbers<[1], [0], [0], [1], [0, 0, 1, 1], [], []>} : vector<8x16xf32>, vector<16x8xf32>, vector<8x8xf32> -> vector<8x8xf32>
    %108 = vector.extract_strided_slice %92 {offsets = [2, 0], sizes = [1, 8], strides = [1, 1]} : vector<3x8xf32> to vector<1x8xf32>
    %109 = vector.broadcast %108 : vector<1x8xf32> to vector<8x8xf32>
    %110 = arith.addf %107, %109 : vector<8x8xf32>
    "tpu.trace_start"() <{level = 10 : i32, message = "qd,kd->qk"}> : () -> ()
    %cst_67 = arith.constant dense<0.000000e+00> : vector<8x8xf32>
    %111 = tpu.matmul %98, %104, %cst_67 {dimension_numbers = #tpu.dot_dimension_numbers<[1], [1], [0], [0], [0, 0, 1, 0], [], []>} : vector<8x8xf32>, vector<8x8xf32>, vector<8x8xf32> -> vector<8x8xf32>
    "tpu.trace_stop"() : () -> ()
    %cst_68 = arith.constant 0.353553385 : f32
    %112 = vector.broadcast %cst_68 : f32 to vector<8x8xf32>
    %113 = arith.mulf %111, %112 : vector<8x8xf32>
    %cst_69 = arith.constant dense<0xFF800000> : vector<8xf32>
    %114 = vector.multi_reduction <maximumf>, %113, %cst_69 [1] : vector<8x8xf32> to vector<8xf32>
    %115 = vector.shape_cast %114 : vector<8xf32> to vector<8x1xf32>
    %116 = vector.broadcast %115 : vector<8x1xf32> to vector<8x8xf32>
    %117 = arith.subf %113, %116 : vector<8x8xf32>
    %118 = math.exp %117 : vector<8x8xf32>
    %cst_70 = arith.constant dense<0.000000e+00> : vector<8xf32>
    %119 = vector.multi_reduction <add>, %118, %cst_70 [1] : vector<8x8xf32> to vector<8xf32>
    %120 = vector.shape_cast %119 : vector<8xf32> to vector<8x1xf32>
    %121 = vector.broadcast %120 : vector<8x1xf32> to vector<8x8xf32>
    %122 = arith.divf %118, %121 : vector<8x8xf32>
    %cst_71 = arith.constant dense<0.000000e+00> : vector<8x8xf32>
    %123 = tpu.matmul %122, %110, %cst_71 {dimension_numbers = #tpu.dot_dimension_numbers<[1], [0], [0], [1], [0, 0, 1, 1], [], []>} : vector<8x8xf32>, vector<8x8xf32>, vector<8x8xf32> -> vector<8x8xf32>
    %c0_72 = arith.constant 0 : index
    %c1_73 = arith.constant 1 : index
    %c0_74 = arith.constant 0 : index
    %c0_75 = arith.constant 0 : index
    %124 = vector.load %arg9[%c0_72, %c1_73, %c0_74, %c0_75] : memref<2x2x8x16xf32, #tpu.memory_space<vmem>>, vector<1x1x8x16xf32>
    %125 = vector.shape_cast %124 : vector<1x1x8x16xf32> to vector<8x16xf32>
    %cst_76 = arith.constant dense<0.000000e+00> : vector<8x16xf32>
    %126 = tpu.matmul %123, %125, %cst_76 {dimension_numbers = #tpu.dot_dimension_numbers<[1], [0], [0], [1], [0, 0, 1, 1], [], []>} : vector<8x8xf32>, vector<8x16xf32>, vector<8x16xf32> -> vector<8x16xf32>
    %127 = arith.addf %90, %126 : vector<8x16xf32>
    %128 = vector.extract_strided_slice %52 {offsets = [0, 0], sizes = [1, 16], strides = [1, 1]} : vector<6x16xf32> to vector<1x16xf32>
    %129 = vector.broadcast %128 : vector<1x16xf32> to vector<8x16xf32>
    %130 = arith.addf %127, %129 : vector<8x16xf32>
    %131 = arith.addf %50, %130 : vector<8x16xf32>
    %132 = vector.extract_strided_slice %52 {offsets = [2, 0], sizes = [1, 16], strides = [1, 1]} : vector<6x16xf32> to vector<1x16xf32>
    %133 = vector.extract_strided_slice %52 {offsets = [3, 0], sizes = [1, 16], strides = [1, 1]} : vector<6x16xf32> to vector<1x16xf32>
    %cst_77 = arith.constant dense<0.000000e+00> : vector<8xf32>
    %134 = vector.multi_reduction <add>, %131, %cst_77 [1] : vector<8x16xf32> to vector<8xf32>
    %135 = vector.shape_cast %134 : vector<8xf32> to vector<8x1xf32>
    %cst_78 = arith.constant 1.600000e+01 : f32
    %136 = vector.broadcast %cst_78 : f32 to vector<8x1xf32>
    %137 = arith.divf %135, %136 : vector<8x1xf32>
    %138 = vector.broadcast %137 : vector<8x1xf32> to vector<8x16xf32>
    %139 = arith.subf %131, %138 : vector<8x16xf32>
    %140 = arith.mulf %139, %139 : vector<8x16xf32>
    %cst_79 = arith.constant dense<0.000000e+00> : vector<8xf32>
    %141 = vector.multi_reduction <add>, %140, %cst_79 [1] : vector<8x16xf32> to vector<8xf32>
    %142 = vector.shape_cast %141 : vector<8xf32> to vector<8x1xf32>
    %cst_80 = arith.constant 1.600000e+01 : f32
    %143 = vector.broadcast %cst_80 : f32 to vector<8x1xf32>
    %144 = arith.divf %142, %143 : vector<8x1xf32>
    %145 = vector.broadcast %137 : vector<8x1xf32> to vector<8x16xf32>
    %146 = arith.subf %131, %145 : vector<8x16xf32>
    %cst_81 = arith.constant 9.99999974E-6 : f32
    %147 = vector.broadcast %cst_81 : f32 to vector<8x1xf32>
    %148 = arith.addf %144, %147 : vector<8x1xf32>
    %149 = math.rsqrt %148 : vector<8x1xf32>
    %150 = vector.broadcast %149 : vector<8x1xf32> to vector<8x16xf32>
    %151 = arith.mulf %146, %150 : vector<8x16xf32>
    %152 = vector.broadcast %132 : vector<1x16xf32> to vector<8x16xf32>
    %153 = arith.mulf %151, %152 : vector<8x16xf32>
    %154 = vector.broadcast %133 : vector<1x16xf32> to vector<8x16xf32>
    %155 = arith.addf %153, %154 : vector<8x16xf32>
    %c0_82 = arith.constant 0 : index
    %c0_83 = arith.constant 0 : index
    %c0_84 = arith.constant 0 : index
    %156 = vector.load %arg11[%c0_82, %c0_83, %c0_84] : memref<2x16x64xf32, #tpu.memory_space<vmem>>, vector<1x16x64xf32>
    %157 = vector.shape_cast %156 : vector<1x16x64xf32> to vector<16x64xf32>
    %cst_85 = arith.constant dense<0.000000e+00> : vector<8x64xf32>
    %158 = tpu.matmul %155, %157, %cst_85 {dimension_numbers = #tpu.dot_dimension_numbers<[1], [0], [0], [1], [0, 0, 1, 1], [], []>} : vector<8x16xf32>, vector<16x64xf32>, vector<8x64xf32> -> vector<8x64xf32>
    %c0_86 = arith.constant 0 : index
    %c0_87 = arith.constant 0 : index
    %c0_88 = arith.constant 0 : index
    %159 = vector.load %arg12[%c0_86, %c0_87, %c0_88] : memref<2x1x64xf32, #tpu.memory_space<vmem>>, vector<1x1x64xf32>
    %160 = vector.shape_cast %159 : vector<1x1x64xf32> to vector<1x64xf32>
    %161 = vector.broadcast %160 : vector<1x64xf32> to vector<8x64xf32>
    %162 = arith.addf %158, %161 : vector<8x64xf32>
    %163 = arith.mulf %162, %162 : vector<8x64xf32>
    %164 = arith.mulf %162, %163 : vector<8x64xf32>
    %cst_89 = arith.constant 4.471500e-02 : f32
    %165 = vector.broadcast %cst_89 : f32 to vector<8x64xf32>
    %166 = arith.mulf %165, %164 : vector<8x64xf32>
    %167 = arith.addf %162, %166 : vector<8x64xf32>
    %cst_90 = arith.constant 0.797884583 : f32
    %168 = vector.broadcast %cst_90 : f32 to vector<8x64xf32>
    %169 = arith.mulf %168, %167 : vector<8x64xf32>
    %170 = math.tanh %169 : vector<8x64xf32>
    %cst_91 = arith.constant 1.000000e+00 : f32
    %171 = vector.broadcast %cst_91 : f32 to vector<8x64xf32>
    %172 = arith.addf %171, %170 : vector<8x64xf32>
    %cst_92 = arith.constant 5.000000e-01 : f32
    %173 = vector.broadcast %cst_92 : f32 to vector<8x64xf32>
    %174 = arith.mulf %173, %172 : vector<8x64xf32>
    %175 = arith.mulf %162, %174 : vector<8x64xf32>
    %c0_93 = arith.constant 0 : index
    %c0_94 = arith.constant 0 : index
    %c0_95 = arith.constant 0 : index
    %176 = vector.load %arg13[%c0_93, %c0_94, %c0_95] : memref<2x64x16xf32, #tpu.memory_space<vmem>>, vector<1x64x16xf32>
    %177 = vector.shape_cast %176 : vector<1x64x16xf32> to vector<64x16xf32>
    %cst_96 = arith.constant dense<0.000000e+00> : vector<8x16xf32>
    %178 = tpu.matmul %175, %177, %cst_96 {dimension_numbers = #tpu.dot_dimension_numbers<[1], [0], [0], [1], [0, 0, 1, 1], [], []>} : vector<8x64xf32>, vector<64x16xf32>, vector<8x16xf32> -> vector<8x16xf32>
    %179 = vector.extract_strided_slice %52 {offsets = [1, 0], sizes = [1, 16], strides = [1, 1]} : vector<6x16xf32> to vector<1x16xf32>
    %180 = vector.broadcast %179 : vector<1x16xf32> to vector<8x16xf32>
    %181 = arith.addf %178, %180 : vector<8x16xf32>
    %182 = arith.addf %155, %181 : vector<8x16xf32>
    %183 = vector.extract_strided_slice %52 {offsets = [4, 0], sizes = [1, 16], strides = [1, 1]} : vector<6x16xf32> to vector<1x16xf32>
    %184 = vector.extract_strided_slice %52 {offsets = [5, 0], sizes = [1, 16], strides = [1, 1]} : vector<6x16xf32> to vector<1x16xf32>
    %cst_97 = arith.constant dense<0.000000e+00> : vector<8xf32>
    %185 = vector.multi_reduction <add>, %182, %cst_97 [1] : vector<8x16xf32> to vector<8xf32>
    %186 = vector.shape_cast %185 : vector<8xf32> to vector<8x1xf32>
    %cst_98 = arith.constant 1.600000e+01 : f32
    %187 = vector.broadcast %cst_98 : f32 to vector<8x1xf32>
    %188 = arith.divf %186, %187 : vector<8x1xf32>
    %189 = vector.broadcast %188 : vector<8x1xf32> to vector<8x16xf32>
    %190 = arith.subf %182, %189 : vector<8x16xf32>
    %191 = arith.mulf %190, %190 : vector<8x16xf32>
    %cst_99 = arith.constant dense<0.000000e+00> : vector<8xf32>
    %192 = vector.multi_reduction <add>, %191, %cst_99 [1] : vector<8x16xf32> to vector<8xf32>
    %193 = vector.shape_cast %192 : vector<8xf32> to vector<8x1xf32>
    %cst_100 = arith.constant 1.600000e+01 : f32
    %194 = vector.broadcast %cst_100 : f32 to vector<8x1xf32>
    %195 = arith.divf %193, %194 : vector<8x1xf32>
    %196 = vector.broadcast %188 : vector<8x1xf32> to vector<8x16xf32>
    %197 = arith.subf %182, %196 : vector<8x16xf32>
    %cst_101 = arith.constant 9.99999974E-6 : f32
    %198 = vector.broadcast %cst_101 : f32 to vector<8x1xf32>
    %199 = arith.addf %195, %198 : vector<8x1xf32>
    %200 = math.rsqrt %199 : vector<8x1xf32>
    %201 = vector.broadcast %200 : vector<8x1xf32> to vector<8x16xf32>
    %202 = arith.mulf %197, %201 : vector<8x16xf32>
    %203 = vector.broadcast %183 : vector<1x16xf32> to vector<8x16xf32>
    %204 = arith.mulf %202, %203 : vector<8x16xf32>
    %205 = vector.broadcast %184 : vector<1x16xf32> to vector<8x16xf32>
    %206 = arith.addf %204, %205 : vector<8x16xf32>
    %c1_102 = arith.constant 1 : index
    %c0_103 = arith.constant 0 : index
    %c0_104 = arith.constant 0 : index
    %207 = vector.load %arg10[%c1_102, %c0_103, %c0_104] : memref<2x6x16xf32, #tpu.memory_space<vmem>>, vector<1x6x16xf32>
    %208 = vector.shape_cast %207 : vector<1x6x16xf32> to vector<6x16xf32>
    %cst_105 = arith.constant 0.000000e+00 : f32
    %209 = vector.broadcast %cst_105 : f32 to vector<8x16xf32>
    %c1_106 = arith.constant 1 : index
    %c0_107 = arith.constant 0 : index
    %c0_108 = arith.constant 0 : index
    %c0_109 = arith.constant 0 : index
    %210 = vector.load %arg8[%c1_106, %c0_107, %c0_108, %c0_109] : memref<2x2x3x8xf32, #tpu.memory_space<vmem>>, vector<1x1x3x8xf32>
    %211 = vector.shape_cast %210 : vector<1x1x3x8xf32> to vector<3x8xf32>
    %c1_110 = arith.constant 1 : index
    %c0_111 = arith.constant 0 : index
    %c0_112 = arith.constant 0 : index
    %c0_113 = arith.constant 0 : index
    %212 = vector.load %arg7[%c1_110, %c0_111, %c0_112, %c0_113] : memref<2x6x16x8xf32, #tpu.memory_space<vmem>>, vector<1x1x16x8xf32>
    %213 = vector.shape_cast %212 : vector<1x1x16x8xf32> to vector<16x8xf32>
    %cst_114 = arith.constant dense<0.000000e+00> : vector<8x8xf32>
    %214 = tpu.matmul %206, %213, %cst_114 {dimension_numbers = #tpu.dot_dimension_numbers<[1], [0], [0], [1], [0, 0, 1, 1], [], []>} : vector<8x16xf32>, vector<16x8xf32>, vector<8x8xf32> -> vector<8x8xf32>
    %215 = vector.extract_strided_slice %211 {offsets = [0, 0], sizes = [1, 8], strides = [1, 1]} : vector<3x8xf32> to vector<1x8xf32>
    %216 = vector.broadcast %215 : vector<1x8xf32> to vector<8x8xf32>
    %217 = arith.addf %214, %216 : vector<8x8xf32>
    %c1_115 = arith.constant 1 : index
    %c1_116 = arith.constant 1 : index
    %c0_117 = arith.constant 0 : index
    %c0_118 = arith.constant 0 : index
    %218 = vector.load %arg7[%c1_115, %c1_116, %c0_117, %c0_118] : memref<2x6x16x8xf32, #tpu.memory_space<vmem>>, vector<1x1x16x8xf32>
    %219 = vector.shape_cast %218 : vector<1x1x16x8xf32> to vector<16x8xf32>
    %cst_119 = arith.constant dense<0.000000e+00> : vector<8x8xf32>
    %220 = tpu.matmul %206, %219, %cst_119 {dimension_numbers = #tpu.dot_dimension_numbers<[1], [0], [0], [1], [0, 0, 1, 1], [], []>} : vector<8x16xf32>, vector<16x8xf32>, vector<8x8xf32> -> vector<8x8xf32>
    %221 = vector.extract_strided_slice %211 {offsets = [1, 0], sizes = [1, 8], strides = [1, 1]} : vector<3x8xf32> to vector<1x8xf32>
    %222 = vector.broadcast %221 : vector<1x8xf32> to vector<8x8xf32>
    %223 = arith.addf %220, %222 : vector<8x8xf32>
    %c1_120 = arith.constant 1 : index
    %c2_121 = arith.constant 2 : index
    %c0_122 = arith.constant 0 : index
    %c0_123 = arith.constant 0 : index
    %224 = vector.load %arg7[%c1_120, %c2_121, %c0_122, %c0_123] : memref<2x6x16x8xf32, #tpu.memory_space<vmem>>, vector<1x1x16x8xf32>
    %225 = vector.shape_cast %224 : vector<1x1x16x8xf32> to vector<16x8xf32>
    %cst_124 = arith.constant dense<0.000000e+00> : vector<8x8xf32>
    %226 = tpu.matmul %206, %225, %cst_124 {dimension_numbers = #tpu.dot_dimension_numbers<[1], [0], [0], [1], [0, 0, 1, 1], [], []>} : vector<8x16xf32>, vector<16x8xf32>, vector<8x8xf32> -> vector<8x8xf32>
    %227 = vector.extract_strided_slice %211 {offsets = [2, 0], sizes = [1, 8], strides = [1, 1]} : vector<3x8xf32> to vector<1x8xf32>
    %228 = vector.broadcast %227 : vector<1x8xf32> to vector<8x8xf32>
    %229 = arith.addf %226, %228 : vector<8x8xf32>
    "tpu.trace_start"() <{level = 10 : i32, message = "qd,kd->qk"}> : () -> ()
    %cst_125 = arith.constant dense<0.000000e+00> : vector<8x8xf32>
    %230 = tpu.matmul %217, %223, %cst_125 {dimension_numbers = #tpu.dot_dimension_numbers<[1], [1], [0], [0], [0, 0, 1, 0], [], []>} : vector<8x8xf32>, vector<8x8xf32>, vector<8x8xf32> -> vector<8x8xf32>
    "tpu.trace_stop"() : () -> ()
    %cst_126 = arith.constant 0.353553385 : f32
    %231 = vector.broadcast %cst_126 : f32 to vector<8x8xf32>
    %232 = arith.mulf %230, %231 : vector<8x8xf32>
    %cst_127 = arith.constant dense<0xFF800000> : vector<8xf32>
    %233 = vector.multi_reduction <maximumf>, %232, %cst_127 [1] : vector<8x8xf32> to vector<8xf32>
    %234 = vector.shape_cast %233 : vector<8xf32> to vector<8x1xf32>
    %235 = vector.broadcast %234 : vector<8x1xf32> to vector<8x8xf32>
    %236 = arith.subf %232, %235 : vector<8x8xf32>
    %237 = math.exp %236 : vector<8x8xf32>
    %cst_128 = arith.constant dense<0.000000e+00> : vector<8xf32>
    %238 = vector.multi_reduction <add>, %237, %cst_128 [1] : vector<8x8xf32> to vector<8xf32>
    %239 = vector.shape_cast %238 : vector<8xf32> to vector<8x1xf32>
    %240 = vector.broadcast %239 : vector<8x1xf32> to vector<8x8xf32>
    %241 = arith.divf %237, %240 : vector<8x8xf32>
    %cst_129 = arith.constant dense<0.000000e+00> : vector<8x8xf32>
    %242 = tpu.matmul %241, %229, %cst_129 {dimension_numbers = #tpu.dot_dimension_numbers<[1], [0], [0], [1], [0, 0, 1, 1], [], []>} : vector<8x8xf32>, vector<8x8xf32>, vector<8x8xf32> -> vector<8x8xf32>
    %c1_130 = arith.constant 1 : index
    %c0_131 = arith.constant 0 : index
    %c0_132 = arith.constant 0 : index
    %c0_133 = arith.constant 0 : index
    %243 = vector.load %arg9[%c1_130, %c0_131, %c0_132, %c0_133] : memref<2x2x8x16xf32, #tpu.memory_space<vmem>>, vector<1x1x8x16xf32>
    %244 = vector.shape_cast %243 : vector<1x1x8x16xf32> to vector<8x16xf32>
    %cst_134 = arith.constant dense<0.000000e+00> : vector<8x16xf32>
    %245 = tpu.matmul %242, %244, %cst_134 {dimension_numbers = #tpu.dot_dimension_numbers<[1], [0], [0], [1], [0, 0, 1, 1], [], []>} : vector<8x8xf32>, vector<8x16xf32>, vector<8x16xf32> -> vector<8x16xf32>
    %246 = arith.addf %209, %245 : vector<8x16xf32>
    %c1_135 = arith.constant 1 : index
    %c1_136 = arith.constant 1 : index
    %c0_137 = arith.constant 0 : index
    %c0_138 = arith.constant 0 : index
    %247 = vector.load %arg8[%c1_135, %c1_136, %c0_137, %c0_138] : memref<2x2x3x8xf32, #tpu.memory_space<vmem>>, vector<1x1x3x8xf32>
    %248 = vector.shape_cast %247 : vector<1x1x3x8xf32> to vector<3x8xf32>
    %c1_139 = arith.constant 1 : index
    %c3_140 = arith.constant 3 : index
    %c0_141 = arith.constant 0 : index
    %c0_142 = arith.constant 0 : index
    %249 = vector.load %arg7[%c1_139, %c3_140, %c0_141, %c0_142] : memref<2x6x16x8xf32, #tpu.memory_space<vmem>>, vector<1x1x16x8xf32>
    %250 = vector.shape_cast %249 : vector<1x1x16x8xf32> to vector<16x8xf32>
    %cst_143 = arith.constant dense<0.000000e+00> : vector<8x8xf32>
    %251 = tpu.matmul %206, %250, %cst_143 {dimension_numbers = #tpu.dot_dimension_numbers<[1], [0], [0], [1], [0, 0, 1, 1], [], []>} : vector<8x16xf32>, vector<16x8xf32>, vector<8x8xf32> -> vector<8x8xf32>
    %252 = vector.extract_strided_slice %248 {offsets = [0, 0], sizes = [1, 8], strides = [1, 1]} : vector<3x8xf32> to vector<1x8xf32>
    %253 = vector.broadcast %252 : vector<1x8xf32> to vector<8x8xf32>
    %254 = arith.addf %251, %253 : vector<8x8xf32>
    %c1_144 = arith.constant 1 : index
    %c4_145 = arith.constant 4 : index
    %c0_146 = arith.constant 0 : index
    %c0_147 = arith.constant 0 : index
    %255 = vector.load %arg7[%c1_144, %c4_145, %c0_146, %c0_147] : memref<2x6x16x8xf32, #tpu.memory_space<vmem>>, vector<1x1x16x8xf32>
    %256 = vector.shape_cast %255 : vector<1x1x16x8xf32> to vector<16x8xf32>
    %cst_148 = arith.constant dense<0.000000e+00> : vector<8x8xf32>
    %257 = tpu.matmul %206, %256, %cst_148 {dimension_numbers = #tpu.dot_dimension_numbers<[1], [0], [0], [1], [0, 0, 1, 1], [], []>} : vector<8x16xf32>, vector<16x8xf32>, vector<8x8xf32> -> vector<8x8xf32>
    %258 = vector.extract_strided_slice %248 {offsets = [1, 0], sizes = [1, 8], strides = [1, 1]} : vector<3x8xf32> to vector<1x8xf32>
    %259 = vector.broadcast %258 : vector<1x8xf32> to vector<8x8xf32>
    %260 = arith.addf %257, %259 : vector<8x8xf32>
    %c1_149 = arith.constant 1 : index
    %c5_150 = arith.constant 5 : index
    %c0_151 = arith.constant 0 : index
    %c0_152 = arith.constant 0 : index
    %261 = vector.load %arg7[%c1_149, %c5_150, %c0_151, %c0_152] : memref<2x6x16x8xf32, #tpu.memory_space<vmem>>, vector<1x1x16x8xf32>
    %262 = vector.shape_cast %261 : vector<1x1x16x8xf32> to vector<16x8xf32>
    %cst_153 = arith.constant dense<0.000000e+00> : vector<8x8xf32>
    %263 = tpu.matmul %206, %262, %cst_153 {dimension_numbers = #tpu.dot_dimension_numbers<[1], [0], [0], [1], [0, 0, 1, 1], [], []>} : vector<8x16xf32>, vector<16x8xf32>, vector<8x8xf32> -> vector<8x8xf32>
    %264 = vector.extract_strided_slice %248 {offsets = [2, 0], sizes = [1, 8], strides = [1, 1]} : vector<3x8xf32> to vector<1x8xf32>
    %265 = vector.broadcast %264 : vector<1x8xf32> to vector<8x8xf32>
    %266 = arith.addf %263, %265 : vector<8x8xf32>
    "tpu.trace_start"() <{level = 10 : i32, message = "qd,kd->qk"}> : () -> ()
    %cst_154 = arith.constant dense<0.000000e+00> : vector<8x8xf32>
    %267 = tpu.matmul %254, %260, %cst_154 {dimension_numbers = #tpu.dot_dimension_numbers<[1], [1], [0], [0], [0, 0, 1, 0], [], []>} : vector<8x8xf32>, vector<8x8xf32>, vector<8x8xf32> -> vector<8x8xf32>
    "tpu.trace_stop"() : () -> ()
    %cst_155 = arith.constant 0.353553385 : f32
    %268 = vector.broadcast %cst_155 : f32 to vector<8x8xf32>
    %269 = arith.mulf %267, %268 : vector<8x8xf32>
    %cst_156 = arith.constant dense<0xFF800000> : vector<8xf32>
    %270 = vector.multi_reduction <maximumf>, %269, %cst_156 [1] : vector<8x8xf32> to vector<8xf32>
    %271 = vector.shape_cast %270 : vector<8xf32> to vector<8x1xf32>
    %272 = vector.broadcast %271 : vector<8x1xf32> to vector<8x8xf32>
    %273 = arith.subf %269, %272 : vector<8x8xf32>
    %274 = math.exp %273 : vector<8x8xf32>
    %cst_157 = arith.constant dense<0.000000e+00> : vector<8xf32>
    %275 = vector.multi_reduction <add>, %274, %cst_157 [1] : vector<8x8xf32> to vector<8xf32>
    %276 = vector.shape_cast %275 : vector<8xf32> to vector<8x1xf32>
    %277 = vector.broadcast %276 : vector<8x1xf32> to vector<8x8xf32>
    %278 = arith.divf %274, %277 : vector<8x8xf32>
    %cst_158 = arith.constant dense<0.000000e+00> : vector<8x8xf32>
    %279 = tpu.matmul %278, %266, %cst_158 {dimension_numbers = #tpu.dot_dimension_numbers<[1], [0], [0], [1], [0, 0, 1, 1], [], []>} : vector<8x8xf32>, vector<8x8xf32>, vector<8x8xf32> -> vector<8x8xf32>
    %c1_159 = arith.constant 1 : index
    %c1_160 = arith.constant 1 : index
    %c0_161 = arith.constant 0 : index
    %c0_162 = arith.constant 0 : index
    %280 = vector.load %arg9[%c1_159, %c1_160, %c0_161, %c0_162] : memref<2x2x8x16xf32, #tpu.memory_space<vmem>>, vector<1x1x8x16xf32>
    %281 = vector.shape_cast %280 : vector<1x1x8x16xf32> to vector<8x16xf32>
    %cst_163 = arith.constant dense<0.000000e+00> : vector<8x16xf32>
    %282 = tpu.matmul %279, %281, %cst_163 {dimension_numbers = #tpu.dot_dimension_numbers<[1], [0], [0], [1], [0, 0, 1, 1], [], []>} : vector<8x8xf32>, vector<8x16xf32>, vector<8x16xf32> -> vector<8x16xf32>
    %283 = arith.addf %246, %282 : vector<8x16xf32>
    %284 = vector.extract_strided_slice %208 {offsets = [0, 0], sizes = [1, 16], strides = [1, 1]} : vector<6x16xf32> to vector<1x16xf32>
    %285 = vector.broadcast %284 : vector<1x16xf32> to vector<8x16xf32>
    %286 = arith.addf %283, %285 : vector<8x16xf32>
    %287 = arith.addf %206, %286 : vector<8x16xf32>
    %288 = vector.extract_strided_slice %208 {offsets = [2, 0], sizes = [1, 16], strides = [1, 1]} : vector<6x16xf32> to vector<1x16xf32>
    %289 = vector.extract_strided_slice %208 {offsets = [3, 0], sizes = [1, 16], strides = [1, 1]} : vector<6x16xf32> to vector<1x16xf32>
    %cst_164 = arith.constant dense<0.000000e+00> : vector<8xf32>
    %290 = vector.multi_reduction <add>, %287, %cst_164 [1] : vector<8x16xf32> to vector<8xf32>
    %291 = vector.shape_cast %290 : vector<8xf32> to vector<8x1xf32>
    %cst_165 = arith.constant 1.600000e+01 : f32
    %292 = vector.broadcast %cst_165 : f32 to vector<8x1xf32>
    %293 = arith.divf %291, %292 : vector<8x1xf32>
    %294 = vector.broadcast %293 : vector<8x1xf32> to vector<8x16xf32>
    %295 = arith.subf %287, %294 : vector<8x16xf32>
    %296 = arith.mulf %295, %295 : vector<8x16xf32>
    %cst_166 = arith.constant dense<0.000000e+00> : vector<8xf32>
    %297 = vector.multi_reduction <add>, %296, %cst_166 [1] : vector<8x16xf32> to vector<8xf32>
    %298 = vector.shape_cast %297 : vector<8xf32> to vector<8x1xf32>
    %cst_167 = arith.constant 1.600000e+01 : f32
    %299 = vector.broadcast %cst_167 : f32 to vector<8x1xf32>
    %300 = arith.divf %298, %299 : vector<8x1xf32>
    %301 = vector.broadcast %293 : vector<8x1xf32> to vector<8x16xf32>
    %302 = arith.subf %287, %301 : vector<8x16xf32>
    %cst_168 = arith.constant 9.99999974E-6 : f32
    %303 = vector.broadcast %cst_168 : f32 to vector<8x1xf32>
    %304 = arith.addf %300, %303 : vector<8x1xf32>
    %305 = math.rsqrt %304 : vector<8x1xf32>
    %306 = vector.broadcast %305 : vector<8x1xf32> to vector<8x16xf32>
    %307 = arith.mulf %302, %306 : vector<8x16xf32>
    %308 = vector.broadcast %288 : vector<1x16xf32> to vector<8x16xf32>
    %309 = arith.mulf %307, %308 : vector<8x16xf32>
    %310 = vector.broadcast %289 : vector<1x16xf32> to vector<8x16xf32>
    %311 = arith.addf %309, %310 : vector<8x16xf32>
    %c1_169 = arith.constant 1 : index
    %c0_170 = arith.constant 0 : index
    %c0_171 = arith.constant 0 : index
    %312 = vector.load %arg11[%c1_169, %c0_170, %c0_171] : memref<2x16x64xf32, #tpu.memory_space<vmem>>, vector<1x16x64xf32>
    %313 = vector.shape_cast %312 : vector<1x16x64xf32> to vector<16x64xf32>
    %cst_172 = arith.constant dense<0.000000e+00> : vector<8x64xf32>
    %314 = tpu.matmul %311, %313, %cst_172 {dimension_numbers = #tpu.dot_dimension_numbers<[1], [0], [0], [1], [0, 0, 1, 1], [], []>} : vector<8x16xf32>, vector<16x64xf32>, vector<8x64xf32> -> vector<8x64xf32>
    %c1_173 = arith.constant 1 : index
    %c0_174 = arith.constant 0 : index
    %c0_175 = arith.constant 0 : index
    %315 = vector.load %arg12[%c1_173, %c0_174, %c0_175] : memref<2x1x64xf32, #tpu.memory_space<vmem>>, vector<1x1x64xf32>
    %316 = vector.shape_cast %315 : vector<1x1x64xf32> to vector<1x64xf32>
    %317 = vector.broadcast %316 : vector<1x64xf32> to vector<8x64xf32>
    %318 = arith.addf %314, %317 : vector<8x64xf32>
    %319 = arith.mulf %318, %318 : vector<8x64xf32>
    %320 = arith.mulf %318, %319 : vector<8x64xf32>
    %cst_176 = arith.constant 4.471500e-02 : f32
    %321 = vector.broadcast %cst_176 : f32 to vector<8x64xf32>
    %322 = arith.mulf %321, %320 : vector<8x64xf32>
    %323 = arith.addf %318, %322 : vector<8x64xf32>
    %cst_177 = arith.constant 0.797884583 : f32
    %324 = vector.broadcast %cst_177 : f32 to vector<8x64xf32>
    %325 = arith.mulf %324, %323 : vector<8x64xf32>
    %326 = math.tanh %325 : vector<8x64xf32>
    %cst_178 = arith.constant 1.000000e+00 : f32
    %327 = vector.broadcast %cst_178 : f32 to vector<8x64xf32>
    %328 = arith.addf %327, %326 : vector<8x64xf32>
    %cst_179 = arith.constant 5.000000e-01 : f32
    %329 = vector.broadcast %cst_179 : f32 to vector<8x64xf32>
    %330 = arith.mulf %329, %328 : vector<8x64xf32>
    %331 = arith.mulf %318, %330 : vector<8x64xf32>
    %c1_180 = arith.constant 1 : index
    %c0_181 = arith.constant 0 : index
    %c0_182 = arith.constant 0 : index
    %332 = vector.load %arg13[%c1_180, %c0_181, %c0_182] : memref<2x64x16xf32, #tpu.memory_space<vmem>>, vector<1x64x16xf32>
    %333 = vector.shape_cast %332 : vector<1x64x16xf32> to vector<64x16xf32>
    %cst_183 = arith.constant dense<0.000000e+00> : vector<8x16xf32>
    %334 = tpu.matmul %331, %333, %cst_183 {dimension_numbers = #tpu.dot_dimension_numbers<[1], [0], [0], [1], [0, 0, 1, 1], [], []>} : vector<8x64xf32>, vector<64x16xf32>, vector<8x16xf32> -> vector<8x16xf32>
    %335 = vector.extract_strided_slice %208 {offsets = [1, 0], sizes = [1, 16], strides = [1, 1]} : vector<6x16xf32> to vector<1x16xf32>
    %336 = vector.broadcast %335 : vector<1x16xf32> to vector<8x16xf32>
    %337 = arith.addf %334, %336 : vector<8x16xf32>
    %338 = arith.addf %311, %337 : vector<8x16xf32>
    %339 = vector.extract_strided_slice %208 {offsets = [4, 0], sizes = [1, 16], strides = [1, 1]} : vector<6x16xf32> to vector<1x16xf32>
    %340 = vector.extract_strided_slice %208 {offsets = [5, 0], sizes = [1, 16], strides = [1, 1]} : vector<6x16xf32> to vector<1x16xf32>
    %cst_184 = arith.constant dense<0.000000e+00> : vector<8xf32>
    %341 = vector.multi_reduction <add>, %338, %cst_184 [1] : vector<8x16xf32> to vector<8xf32>
    %342 = vector.shape_cast %341 : vector<8xf32> to vector<8x1xf32>
    %cst_185 = arith.constant 1.600000e+01 : f32
    %343 = vector.broadcast %cst_185 : f32 to vector<8x1xf32>
    %344 = arith.divf %342, %343 : vector<8x1xf32>
    %345 = vector.broadcast %344 : vector<8x1xf32> to vector<8x16xf32>
    %346 = arith.subf %338, %345 : vector<8x16xf32>
    %347 = arith.mulf %346, %346 : vector<8x16xf32>
    %cst_186 = arith.constant dense<0.000000e+00> : vector<8xf32>
    %348 = vector.multi_reduction <add>, %347, %cst_186 [1] : vector<8x16xf32> to vector<8xf32>
    %349 = vector.shape_cast %348 : vector<8xf32> to vector<8x1xf32>
    %cst_187 = arith.constant 1.600000e+01 : f32
    %350 = vector.broadcast %cst_187 : f32 to vector<8x1xf32>
    %351 = arith.divf %349, %350 : vector<8x1xf32>
    %352 = vector.broadcast %344 : vector<8x1xf32> to vector<8x16xf32>
    %353 = arith.subf %338, %352 : vector<8x16xf32>
    %cst_188 = arith.constant 9.99999974E-6 : f32
    %354 = vector.broadcast %cst_188 : f32 to vector<8x1xf32>
    %355 = arith.addf %351, %354 : vector<8x1xf32>
    %356 = math.rsqrt %355 : vector<8x1xf32>
    %357 = vector.broadcast %356 : vector<8x1xf32> to vector<8x16xf32>
    %358 = arith.mulf %353, %357 : vector<8x16xf32>
    %359 = vector.broadcast %339 : vector<1x16xf32> to vector<8x16xf32>
    %360 = arith.mulf %358, %359 : vector<8x16xf32>
    %361 = vector.broadcast %340 : vector<1x16xf32> to vector<8x16xf32>
    %362 = arith.addf %360, %361 : vector<8x16xf32>
    %cst_189 = arith.constant dense<0.000000e+00> : vector<16xf32>
    %363 = vector.multi_reduction <add>, %362, %cst_189 [0] : vector<8x16xf32> to vector<16xf32>
    %364 = vector.shape_cast %363 : vector<16xf32> to vector<1x16xf32>
    %cst_190 = arith.constant 8.000000e+00 : f32
    %365 = vector.broadcast %cst_190 : f32 to vector<1x16xf32>
    %366 = arith.divf %364, %365 : vector<1x16xf32>
    %c0_191 = arith.constant 0 : index
    %c0_192 = arith.constant 0 : index
    %367 = vector.load %arg14[%c0_191, %c0_192] : memref<16x3xf32, #tpu.memory_space<vmem>>, vector<16x3xf32>
    %cst_193 = arith.constant dense<0.000000e+00> : vector<1x3xf32>
    %368 = tpu.matmul %366, %367, %cst_193 {dimension_numbers = #tpu.dot_dimension_numbers<[1], [0], [0], [1], [0, 0, 1, 1], [], []>} : vector<1x16xf32>, vector<16x3xf32>, vector<1x3xf32> -> vector<1x3xf32>
    %c0_194 = arith.constant 0 : index
    %c0_195 = arith.constant 0 : index
    %369 = vector.load %arg15[%c0_194, %c0_195] : memref<1x3xf32, #tpu.memory_space<vmem>>, vector<1x3xf32>
    %370 = arith.addf %368, %369 : vector<1x3xf32>
    %c0_196 = arith.constant 0 : index
    %c0_197 = arith.constant 0 : index
    %c0_198 = arith.constant 0 : index
    %371 = vector.load %arg16[%c0_196, %c0_197, %c0_198] : memref<1x1x3xf32, #tpu.memory_space<vmem>>, vector<1x1x3xf32>
    %372 = vector.shape_cast %371 : vector<1x1x3xf32> to vector<1x3xf32>
    %373 = vector.shape_cast %370 : vector<1x3xf32> to vector<1x1x3xf32>
    tpu.vector_store %arg16[%c0_196, %c0_197, %c0_198], %373 {strides = array<i32>} : memref<1x1x3xf32, #tpu.memory_space<vmem>>, vector<1x1x3xf32>,
    return
  }
  func.func @transform_0(%arg0: i32) -> (i32, i32, i32) {
    %c0_i32 = arith.constant 0 : i32
    %c0_i32_0 = arith.constant 0 : i32
    %c0_i32_1 = arith.constant 0 : i32
    return %arg0, %c0_i32, %c0_i32_0 : i32, i32, i32
  }
  func.func @transform_1(%arg0: i32) -> (i32, i32) {
    %c0_i32 = arith.constant 0 : i32
    %c0_i32_0 = arith.constant 0 : i32
    %c0_i32_1 = arith.constant 0 : i32
    return %c0_i32, %c0_i32_0 : i32, i32
  }
  func.func @transform_2(%arg0: i32) -> (i32, i32) {
    %c0_i32 = arith.constant 0 : i32
    %c0_i32_0 = arith.constant 0 : i32
    %c0_i32_1 = arith.constant 0 : i32
    return %c0_i32, %c0_i32_0 : i32, i32
  }
  func.func @transform_3(%arg0: i32) -> (i32, i32) {
    %c0_i32 = arith.constant 0 : i32
    %c0_i32_0 = arith.constant 0 : i32
    %c0_i32_1 = arith.constant 0 : i32
    return %c0_i32, %c0_i32_0 : i32, i32
  }
  func.func @transform_4(%arg0: i32) -> (i32, i32) {
    %c0_i32 = arith.constant 0 : i32
    %c0_i32_0 = arith.constant 0 : i32
    %c0_i32_1 = arith.constant 0 : i32
    return %c0_i32, %c0_i32_0 : i32, i32
  }
  func.func @transform_5(%arg0: i32) -> (i32, i32) {
    %c0_i32 = arith.constant 0 : i32
    %c0_i32_0 = arith.constant 0 : i32
    %c0_i32_1 = arith.constant 0 : i32
    return %c0_i32, %c0_i32_0 : i32, i32
  }
  func.func @transform_6(%arg0: i32) -> (i32, i32, i32, i32) {
    %c0_i32 = arith.constant 0 : i32
    %c0_i32_0 = arith.constant 0 : i32
    %c0_i32_1 = arith.constant 0 : i32
    %c0_i32_2 = arith.constant 0 : i32
    %c0_i32_3 = arith.constant 0 : i32
    return %c0_i32, %c0_i32_0, %c0_i32_1, %c0_i32_2 : i32, i32, i32, i32
  }
  func.func @transform_7(%arg0: i32) -> (i32, i32, i32, i32) {
    %c0_i32 = arith.constant 0 : i32
    %c0_i32_0 = arith.constant 0 : i32
    %c0_i32_1 = arith.constant 0 : i32
    %c0_i32_2 = arith.constant 0 : i32
    %c0_i32_3 = arith.constant 0 : i32
    return %c0_i32, %c0_i32_0, %c0_i32_1, %c0_i32_2 : i32, i32, i32, i32
  }
  func.func @transform_8(%arg0: i32) -> (i32, i32, i32, i32) {
    %c0_i32 = arith.constant 0 : i32
    %c0_i32_0 = arith.constant 0 : i32
    %c0_i32_1 = arith.constant 0 : i32
    %c0_i32_2 = arith.constant 0 : i32
    %c0_i32_3 = arith.constant 0 : i32
    return %c0_i32, %c0_i32_0, %c0_i32_1, %c0_i32_2 : i32, i32, i32, i32
  }
  func.func @transform_9(%arg0: i32) -> (i32, i32, i32) {
    %c0_i32 = arith.constant 0 : i32
    %c0_i32_0 = arith.constant 0 : i32
    %c0_i32_1 = arith.constant 0 : i32
    %c0_i32_2 = arith.constant 0 : i32
    return %c0_i32, %c0_i32_0, %c0_i32_1 : i32, i32, i32
  }
  func.func @transform_10(%arg0: i32) -> (i32, i32, i32) {
    %c0_i32 = arith.constant 0 : i32
    %c0_i32_0 = arith.constant 0 : i32
    %c0_i32_1 = arith.constant 0 : i32
    %c0_i32_2 = arith.constant 0 : i32
    return %c0_i32, %c0_i32_0, %c0_i32_1 : i32, i32, i32
  }
  func.func @transform_11(%arg0: i32) -> (i32, i32, i32) {
    %c0_i32 = arith.constant 0 : i32
    %c0_i32_0 = arith.constant 0 : i32
    %c0_i32_1 = arith.constant 0 : i32
    %c0_i32_2 = arith.constant 0 : i32
    return %c0_i32, %c0_i32_0, %c0_i32_1 : i32, i32, i32
  }
  func.func @transform_12(%arg0: i32) -> (i32, i32, i32) {
    %c0_i32 = arith.constant 0 : i32
    %c0_i32_0 = arith.constant 0 : i32
    %c0_i32_1 = arith.constant 0 : i32
    %c0_i32_2 = arith.constant 0 : i32
    return %c0_i32, %c0_i32_0, %c0_i32_1 : i32, i32, i32
  }
  func.func @transform_13(%arg0: i32) -> (i32, i32) {
    %c0_i32 = arith.constant 0 : i32
    %c0_i32_0 = arith.constant 0 : i32
    %c0_i32_1 = arith.constant 0 : i32
    return %c0_i32, %c0_i32_0 : i32, i32
  }
  func.func @transform_14(%arg0: i32) -> (i32, i32) {
    %c0_i32 = arith.constant 0 : i32
    %c0_i32_0 = arith.constant 0 : i32
    %c0_i32_1 = arith.constant 0 : i32
    return %c0_i32, %c0_i32_0 : i32, i32
  }
  func.func @transform_15(%arg0: i32) -> (i32, i32, i32) {
    %c0_i32 = arith.constant 0 : i32
    %c0_i32_0 = arith.constant 0 : i32
    %c0_i32_1 = arith.constant 0 : i32
    return %arg0, %c0_i32, %c0_i32_0 : i32, i32, i32
  }
}

</mosaic_0001>

<bundles_post_ra>
// kernel: forward.1
= control target key start
LH: loop header
LB: loop body
LE: loop exit
PB: predicated region body
PF: predicated region fallthrough
CT: control target
= control target key end

     0   :  { %s5179_s0 = inlined_call_operand.vmem [shape: f32[2,32,4], index: 0, kind: input, shape index: {}]   ;;  %s5180_s1 = inlined_call_operand.vmem [shape: f32[32,16], index: 1, kind: input, shape index: {}]   ;;  %s5181_s2 = inlined_call_operand.vmem [shape: f32[4,16], index: 2, kind: input, shape index: {}]   ;;  %s5182_s3 = inlined_call_operand.vmem [shape: f32[28,28], index: 3, kind: input, shape index: {}]   ;;  %s5183_s4 = inlined_call_operand.vmem [shape: f32[7,28], index: 4, kind: input, shape index: {}]   ;;  %s5184_s5 = inlined_call_operand.vmem [shape: f32[1,16], index: 5, kind: input, shape index: {}]   ;;  %s5185_s6 = inlined_call_operand.vmem [shape: f32[2,6,16,8], index: 6, kind: input, shape index: {}]   ;;  %s5186_s7 = inlined_call_operand.vmem [shape: f32[2,2,3,8], index: 7, kind: input, shape index: {}]   ;;  %s5187_s8 = inlined_call_operand.vmem [shape: f32[2,2,8,16], index: 8, kind: input, shape index: {}]   ;;  %s5188_s9 = inlined_call_operand.vmem [shape: f32[2,6,16], index: 9, kind: input, shape index: {}]   ;;  %s5189_s10 = inlined_call_operand.vmem [shape: f32[2,16,64], index: 10, kind: input, shape index: {}]   ;;  %s5190_s11 = inlined_call_operand.vmem [shape: f32[2,1,64], index: 11, kind: input, shape index: {}]   ;;  %s5191_s12 = inlined_call_operand.vmem [shape: f32[2,64,16], index: 12, kind: input, shape index: {}]   ;;  %s5192_s13 = inlined_call_operand.vmem [shape: f32[16,3], index: 13, kind: input, shape index: {}]   ;;  %s5193_s14 = inlined_call_operand.vmem [shape: f32[1,3], index: 14, kind: input, shape index: {}]   ;;  %s5194_s15 = inlined_call_operand.hbm [shape: f32[2,1,3], index: 15, kind: output, shape index: {}]  }
   0x1   :  { %5195 = sst [smem:[#allocation6_spill]] %s5179_s0 }
   0x2   :  { %5196 = sst [smem:[#allocation7_spill]] %s5180_s1 }
   0x3   :  { %5197 = sst [smem:[#allocation8_spill]] %s5181_s2 }
   0x4   :  { %5198 = sst [smem:[#allocation9_spill]] %s5182_s3 }
   0x5   :  { %20 = vsyncpa [#allocation3], 0 }
   0x6   :  { %22 = vsyncpa [#allocation3 + $0x1], 0  ;;  %s4555_s18 = smov 0   ;;  %s4557_s19 = smov 0  }
   0x7   :  { %s4559_s20 = smov 0   ;;  %s4561_s21 = smov 0  }
   0x8 LB: > { %s4576_s22 = sadd.s32 4294967295, %s4464_s21   ;;  %s3793_s23 = sadd.s32 4294967294, %s4464_s21   ;;  %s4464_s21 = sphi %s4561_s21, %s5210_s21   ;;  %s4460_s20 = sphi %s4559_s20, %s5209_s20   ;;  %s4456_s19 = sphi %s4557_s19, %s5208_s19   ;;  %s4452_s18 = sphi %s4555_s18, %s5207_s18  }
   0x9   : > { %s4580_s24 = sadd.s32 1, %s4464_s21   ;;  %s355_s25 = sadd.s32 1, %s4460_s20 }
   0xa   : > { %s352_s26 = ssub.s32 %s4464_s21, %s4580_s24  ;;  %p365_p0 = scmp.ne.s32.totalorder %s4460_s20, %s4456_s19 }
   0xb   : > { %p353_p1 = scmp.eq.s32.totalorder %s352_s26, 0  ;;  %p366_p2 = scmp.eq.s32.totalorder %s4576_s22, 1 }
   0xc   : > { %p371_p3 = scmp.ne.s32.totalorder %s4456_s19, %s4452_s18  ;;  %p372_p4 = scmp.eq.s32.totalorder %s3793_s23, 1 }
   0xd   : > { %s4591_s27 = scalar_select %p353_p1, %s4460_s20, %s355_s25  }
   0xe   : > { %p4593_p5 = por %p366_p2, %p365_p0  ;;  %p4597_p6 = por %p372_p4, %p371_p3 }
   0xf   : > { %5199 = sst [smem:[#allocation5_spill]] %s4591_s27  ;;  %p3796_p7 = scmp.ge.s32.totalorder %s4464_s21, 1 }
  0x10   : > { %p440_p8 = scmp.lt.s32.totalorder %s4464_s21, 3 }
  0x12   : > { %p441_p9 = pnand %p3796_p7, %p440_p8 }
  0x13   : > { %p487_p10 = scmp.lt.s32.totalorder (!%p441_p9), %s4576_s22, 1  ;;  %s5202_s0 = sld [smem:[#allocation6_spill]] (!%p441_p9) }
  0x14   : > { %444 = sbr.rel (%p441_p9) target bundleno = 7349 (0x1cb5), region = 80  ;;  %s4466_s26 = smov (!%p441_p9), 8  }
  0x15   : > { %s4467_s27 = smov (!%p441_p9), 16   ;;  %s4470_s17 = smov (!%p441_p9), 20  }
  0x16   : > { %s4471_s23 = smov (!%p441_p9), 24   ;;  %s5203_s1 = sld [smem:[#allocation7_spill]] (!%p441_p9) }
  0x17   : > { %s5204_s2 = sld [smem:[#allocation8_spill]] (!%p441_p9) }
  0x18   : > { %s5205_s3 = sld [smem:[#allocation9_spill]] (!%p441_p9) }
  0x19   : > { %s488_s30 = scalar_select %p487_p10, %s4576_s22, 1  ;;  %vm498_vm0 = vcmask 1043456   ;;  %vm526_vm1 = vcmask 31744   ;;  %vm528_vm2 = vcmask 64512   ;;  %vm530_vm3 = vcmask 97280  }
  0x1a   : > { %vm532_vm4 = vcmask 130048   ;;  %vm534_vm5 = vcmask 162816   ;;  %vm536_vm6 = vcmask 195584   ;;  %v672_v31 = vlaneseq }
  0x1b   : > { %s3908_s16 = sshll.u32 %s488_s30, 5  ;;  %s4468_s30 = smov 4   ;;  %vm1052_vm7 = vcmask 228352   ;;  %vm1062_vm8 = vcmask 224256   ;;  %vm4473_vm9 = vmmov 0   ;;  %vm1291_vm10 = vcmask 1040384  }
  0x1c   : > { %s491_s25 = scalar_lea.vmem %s5202_s0, %s3908_s16  ;;  %s4469_s16 = smov 12   ;;  %v570_v21 = vld [vmem:[%s5203_s1] sm:$0xff]  ;;  %v571_v24 = vld [vmem:[%s5203_s1 + $0x8] sm:$0xff]  ;;  %v573_v25 = vld [vmem:[%s5203_s1 + $0x18] sm:$0xff]  ;;  %v4643_v33 = vshrl.u32 %v672_v31, 7  ;;  %vm2365_vm11 = vcmask 523264  }
  0x1d   : > { %v493_v0 = vld [vmem:[%s491_s25 + $0x8] sm:$0xff]  ;;  %v494_v1 = vld [vmem:[%s491_s25 + $0x10] sm:$0xff]  ;;  %v492_v2 = vld [vmem:[%s491_s25] sm:$0xff]  ;;  %4037 = vmatprep.subr.mxu0 %v570_v21  ;;  %4311 = vmatprep.subr.mxu1 %v571_v24  ;;  %vm3723_vm12 = vcmask 16384  }
  0x1e   : > { %505 = vrot.lane.b32.xlu0 %v493_v0, %s4466_s26  ;;  %v500_v3 = vrot.slane %v493_v0, 4  ;;  %514 = vrot.lane.b32.xlu1 %v494_v1, %s4467_s27  ;;  %v509_v4 = vrot.slane %v494_v1, 4  ;;  %v499_v5 = vrot.slane %v492_v2, 4  ;;  %v495_v6 = vld [vmem:[%s491_s25 + $0x18] sm:$0xff]  ;;  %v572_v28 = vld [vmem:[%s5203_s1 + $0x10] sm:$0xff]  ;;  %v4650_v37 = vsub.s32 0, %v4643_v33 }
  0x1f   : > { %v518_v7 = vrot.slane %v495_v6, 4  ;;  %4038 = vmatpush3.msra.mxu0 %v570_v21  ;;  %4312 = vmatpush3.msra.mxu1 %v571_v24  ;;  %v4655_v38 = vld [vmem:[%s5204_s2] sm:$0xf]  ;;  %v4660_v41 = vsub.s32 2, %v4643_v33  ;;  %v4667_v49 = vsub.s32 1, %v4643_v33 }
  0x20   : > { %v501_v8 = vsel %vm498_vm0, %v499_v5, %v500_v3  ;;  %v510_v9 = vsel %vm498_vm0, %v500_v3, %v509_v4  ;;  %4045 = vmatprep.subr.mxu0 %v571_v24  ;;  %4061 = vmatprep.subr.mxu1 %v573_v25  ;;  %v675_v44 = vrot.slane %v4655_v38, %v4650_v37 }
  0x21   : > { %v519_v10 = vsel %vm498_vm0, %v509_v4, %v518_v7  ;;  %v853_v47 = vrot.slane %v4655_v38, %v4660_v41  ;;  %v764_v55 = vrot.slane %v4655_v38, %v4667_v49  ;;  %v940_v4 = vld [vmem:[%s5205_s3 + $0x8] sm:$0xff] }
  0x22   : > { %502 = vrot.lane.b32.xlu0 %v501_v8, %s4468_s30  ;;  %511 = vrot.lane.b32.xlu1 %v510_v9, %s4469_s16  ;;  %s485_s30 = sand.u32 1, %s4456_s19  }
  0x23   : > { %s486_s0 = scalar_lea.vmem [#allocation2], %s485_s30  ;;  %s3726_s2 = scalar_lea.sflag [#allocation3], %s485_s30 }
  0x24   : > { %s3738_s27 = sshll.u32 %s486_s0, 4  ;;  %s3739_s27 = int_to_ptr.vmem [resolvable:$true] %s3738_s27 }
  0x26   : > { %520 = vrot.lane.b32.xlu0 %v519_v10, %s4470_s17  ;;  %523 = vrot.lane.b32.xlu1 %v495_v6, %s4471_s23  ;;  %v939_v6 = vld [vmem:[%s5205_s3] sm:$0xff]  ;;  %s3905_s23 = sshll.u32 %s4576_s22, 4  ;;  %s4474_s22 = smov [#allocation2]  }
  0x27   : > { %s5144_s1 = scalar_lea.hbm %s5194_s15, %s3905_s23  ;;  %s4408_s16 = sshll.u32 %s4474_s22, 4  ;;  %s4409_s16 = int_to_ptr.vmem [resolvable:$false] %s4408_s16 }
  0x28   : > { %s4410_s17 = scalar_lea.vmem %s4409_s16, 32  ;;  %p4411_p0 = scmp.lt.s32.totalorder %s3739_s27, %s4409_s16 }
  0x90   : > { %v506_v11 = vpop.permute.xlu0 %505  ;;  %v515_v12 = vpop.permute.xlu1 %514 }
  0x94   : > { %v503_v13 = vpop.permute.xlu0 %502  ;;  %v512_v14 = vpop.permute.xlu1 %511 }
  0x95   : > { %v527_v15 = vsel %vm526_vm1, %v492_v2, %v503_v13 }
  0x96   : > { %v529_v16 = vsel %vm528_vm2, %v527_v15, %v506_v11 }
  0x97   : > { %v531_v17 = vsel %vm530_vm3, %v529_v16, %v512_v14  ;;  %v942_v14 = vld [vmem:[%s5205_s3 + $0x18] sm:$0xf] }
  0x98   : > { %v533_v18 = vsel %vm532_vm4, %v531_v17, %v515_v12  ;;  %v521_v19 = vpop.permute.xlu0 %520  ;;  %v524_v20 = vpop.permute.xlu1 %523  ;;  %v941_v12 = vld [vmem:[%s5205_s3 + $0x10] sm:$0xff]  ;;  %s4404_s3 = scalar_lea.vmem %s3739_s27, 16 }
  0x99   : > { %v535_v22 = vsel %vm534_vm5, %v533_v18, %v521_v19  ;;  %p4405_p11 = scmp.ne.s32.totalorder %s3739_s27, %s4404_s3  ;;  %p4412_p1 = scmp.lt.s32.totalorder %s4410_s17, %s4404_s3 }
  0x9a   : > { %v537_v23 = vsel %vm536_vm6, %v535_v22, %v524_v20 }
  0x9b   : > { %538 = vxpose.xlu0.b32.start.end [1/1] (short) (narrow) %v537_v23, 32  ;;  %p4406_p12 = pnand %p4405_p11, %p4593_p5  ;;  %p4413_p2 = por %p4412_p1, %p4411_p0 }
  0x9d   : > { %p4407_p13 = pneg %p4406_p12 }
  0x9f   : > { %p4414_p3 = pnand %p4413_p2, %p4407_p13 }
 0x117   : > { %v554_v26 = vpop.trf.xlu0 }
 0x118   : > { %4039 = vmatprep.mubr.msk.f32.mxu0 %vm528_vm2, %v554_v26 }
 0x11b   : > { %v555_v27 = vpop.trf.xlu0 }
 0x11c   : > { %4040 = vmatmul.mubr.msk.f32.vlgmr.msra.gmra.mxu0 %vm528_vm2, %v555_v27 }
 0x11d   : > { %4046 = vmatpush3.msra.mxu0 %v571_v24 }
 0x11e   : > { %4053 = vmatprep.subr.mxu0 %v572_v28 }
 0x11f   : > { %v556_v29 = vpop.trf.xlu0 }
 0x120   : > { %4042 = vmatprep.mubr.msk.f32.mxu0 %vm528_vm2, %v556_v29  ;;  %4050 = vmatprep.mubr.msk.f32.mxu1 %vm528_vm2, %v556_v29 }
 0x123   : > { %v557_v30 = vpop.trf.xlu0 }
 0x124   : > { %4043 = vmatmul.mubr.msk.f32.gmra.mxu0 %vm528_vm2, %v557_v30  ;;  %4051 = vmatmul.mubr.msk.f32.vlgmr.msra.gmra.mxu1 %vm528_vm2, %v557_v30 }
 0x125   : > { %4047 = vmatprep.mubr.msk.f32.mxu0 %vm528_vm2, %v554_v26  ;;  %4063 = vmatprep.mubr.msk.f32.mxu1 %vm528_vm2, %v554_v26 }
 0x126   : > { %4062 = vmatpush3.msra.mxu1 %v573_v25 }
 0x128   : > { %4048 = vmatmul.mubr.msk.f32.vlgmr.msra.gmra.mxu0 %vm528_vm2, %v555_v27  ;;  %4064 = vmatmul.mubr.msk.f32.vlgmr.msra.gmra.mxu1 %vm528_vm2, %v555_v27 }
 0x129   : > { %4054 = vmatpush3.msra.mxu0 %v572_v28  ;;  %4055 = vmatprep.mubr.msk.f32.mxu0 %vm528_vm2, %v554_v26 }
 0x12a   : > { %4066 = vmatprep.mubr.msk.f32.mxu1 %vm528_vm2, %v556_v29 }
 0x12c   : > { %4056 = vmatmul.mubr.msk.f32.vlgmr.msra.gmra.mxu0 %vm528_vm2, %v555_v27  ;;  %4067 = vmatmul.mubr.msk.f32.gmra.mxu1 %vm528_vm2, %v557_v30 }
 0x12d   : > { %4058 = vmatprep.mubr.msk.f32.mxu0 %vm528_vm2, %v556_v29 }
 0x130   : > { %4059 = vmatmul.mubr.msk.f32.gmra.mxu0 %vm528_vm2, %v557_v30 }
 0x1dc   : > { %v4641_v32 = vpop.f32.mrf.mxu0 }
 0x1de   : > { %v4645_v34 = vpop.f32.mrf.mxu0 }
 0x1e4   : > { %v4647_v35 = vpop.f32.mrf.mxu0  ;;  %v4052_v36 = vpop.f32.mrf.mxu1 }
 0x1e5   : > { %v758_v3 = vadd.f32 %v4052_v36, %v675_v44 }
 0x1e6   : > { %v4657_v39 = vpop.f32.mrf.mxu0  ;;  %v752_v40 = vpop.f32.mrf.mxu1 }
 0x1e7   : > { %v753_v2 = vadd.f32 %v752_v40, %v675_v44 }
 0x1e8   : > { %v4049_v42 = vpop.f32.mrf.mxu0  ;;  %v4065_v43 = vpop.f32.mrf.mxu1 }
 0x1e9   : > { %v926_v58 = vadd.f32 %v4065_v43, %v853_v47  ;;  %v748_v1 = vadd.f32 %v4049_v42, %v675_v44 }
 0x1ea   : > { %v742_v45 = vpop.f32.mrf.mxu0  ;;  %v920_v46 = vpop.f32.mrf.mxu1 }
 0x1eb   : > { %v743_v48 = vadd.f32 %v742_v45, %v675_v44  ;;  %v921_v61 = vadd.f32 %v920_v46, %v853_v47 }
 0x1ec   : > { %v4057_v50 = vpop.f32.mrf.mxu0  ;;  %v4068_v51 = vpop.f32.mrf.mxu1 }
 0x1ed   : > { %v936_v52 = vadd.f32 %v4068_v51, %v853_v47  ;;  %4077 = vmatprep.mubr.msk.f32.mxu0 %vm532_vm4, %v743_v48  ;;  %v837_v63 = vadd.f32 %v4057_v50, %v764_v55 }
 0x1ee   : > { %v831_v53 = vpop.f32.mrf.mxu0  ;;  %v930_v54 = vpop.f32.mrf.mxu1 }
 0x1ef   : > { %v931_v56 = vadd.f32 %v930_v54, %v853_v47  ;;  %4083 = vmatprep.subr.msk.mxu1 %vm498_vm0, %v936_v52  ;;  %v832_v0 = vadd.f32 %v831_v53, %v764_v55 }
 0x1f0   : > { %v4060_v57 = vpop.f32.mrf.mxu0  ;;  %4084 = vmatpush3.msk.msra.mxu1 %vm498_vm0, %v936_v52 }
 0x1f1   : > { %v847_v59 = vadd.f32 %v4060_v57, %v764_v55  ;;  %4085 = vmatprep.subr.mxu1 %v931_v56 }
 0x1f2   : > { %v841_v60 = vpop.f32.mrf.mxu0  ;;  %4086 = vmatpush3.msra.mxu1 %v931_v56 }
 0x1f3   : > { %v842_v62 = vadd.f32 %v841_v60, %v764_v55  ;;  %4069 = vmatprep.subr.msk.mxu0 %vm532_vm4, %v847_v59  ;;  %4087 = vmatprep.subr.mxu1 %v926_v58 }
 0x1f4   : > { %4070 = vmatpush3.xpose.msk.msra.mxu0 %vm532_vm4, %v847_v59  ;;  %4088 = vmatpush3.msra.mxu1 %v926_v58 }
 0x1f5   : > { %4071 = vmatprep.subr.msk.mxu0 %vm532_vm4, %v842_v62  ;;  %4089 = vmatprep.subr.mxu1 %v921_v61 }
 0x1f6   : > { %4090 = vmatpush3.msra.mxu1 %v921_v61  ;;  %v4472_v61 = vmov 0.0  }
 0x1f7   : > { %4097 = vmatprep.subr.mxu1 %v4472_v61 }
 0x1f8   : > { %4072 = vmatpush3.xpose.msk.msra.mxu0 %vm532_vm4, %v842_v62  ;;  %v3832_v62 = vld [vmem:[%s5185_s6 + $0x18] sm:$0xff] }
 0x1f9   : > { %4073 = vmatprep.subr.msk.mxu0 %vm532_vm4, %v837_v63 }
 0x1fc   : > { %4074 = vmatpush3.xpose.msk.msra.mxu0 %vm532_vm4, %v837_v63 }
 0x1fd   : > { %4075 = vmatprep.subr.msk.mxu0 %vm532_vm4, %v832_v0 }
 0x200   : > { %4076 = vmatpush3.xpose.msk.msra.mxu0 %vm532_vm4, %v832_v0  ;;  %v4720_v0 = vsub.s32 3, %v4643_v33 }
 0x201   : > { %4115 = vmatprep.subr.mxu0 %v4472_v61 }
 0x203   : > { %4078 = vmatmul.mubr.msk.f32.vlgmr.msra.gmra.mxu0 %vm532_vm4, %v748_v1 }
 0x204   : > { %4080 = vmatprep.mubr.msk.f32.mxu0 %vm532_vm4, %v753_v2  ;;  %4116 = vmatpush3.msra.mxu0 %v3832_v62  ;;  %v1201_v2 = vrot.slane %v4655_v38, %v4720_v0 }
 0x205   : > { %4117 = vmatprep.subr.mxu0 %v4472_v61 }
 0x207   : > { %4081 = vmatmul.mubr.msk.f32.gmra.mxu0 %vm532_vm4, %v758_v3 }
 0x208   : > { %4119 = vmatprep.mubr.msk.f32.mxu0 %vm4473_vm9, %v4472_v61 }
 0x2c3   : > { %v4079_v5 = vpop.f32.mrf.mxu0 }
 0x2c4   : > { %v1039_v7 = vadd.f32 %v4079_v5, %v940_v4 }
 0x2c5   : > { %v1033_v8 = vpop.f32.mrf.mxu0 }
 0x2c6   : > { %v1034_v9 = vadd.f32 %v1033_v8, %v939_v6  ;;  %v1056_v10 = vsel %vm1052_vm7, %v1039_v7, -inf }
 0x2c7   : > { %1057 = vmax.xlane.f32.xlu0 %v1056_v10  ;;  %v4082_v11 = vpop.f32.mrf.mxu0 }
 0x2c8   : > { %v1053_v13 = vsel %vm1052_vm7, %v1034_v9, -inf  ;;  %v1049_v17 = vadd.f32 %v4082_v11, %v942_v14 }
 0x2c9   : > { %v1043_v15 = vpop.f32.mrf.mxu0  ;;  %1054 = vmax.xlane.f32.xlu1 %v1053_v13  ;;  %v1287_v13 = vld [vmem:[%s5184_s5] sm:$0x1] }
 0x2ca   : > { %v1044_v16 = vadd.f32 %v1043_v15, %v941_v12  ;;  %v1063_v19 = vsel %vm1062_vm8, %v1049_v17, -inf }
 0x2cc   : > { %v1059_v18 = vsel %vm1052_vm7, %v1044_v16, -inf }
 0x2cd   : > { %1060 = vmax.xlane.f32.xlu1 %v1059_v18  ;;  %v3834_v18 = vld [vmem:[%s5185_s6 + $0x20] sm:$0xff] }
 0x2d1   : > { %1064 = vmax.xlane.f32.xlu1 %v1063_v19  ;;  %v1294_v19 = vld [vmem:[%s5186_s7] sm:$0x7] }
 0x350   : > { %v1058_v20 = vpop.xlane.xlu0 %1057 }
 0x351   : > { %v1067_v21 = vsub.f32 %v1039_v7, %v1058_v20  ;;  %v1380_v20 = vrot.slane %v1294_v19, %v4667_v49 }
 0x352   : > { %v1055_v22 = vpop.xlane.xlu1 %1054 }
 0x353   : > { %v1072_v23 = vmul.f32 1.442695, %v1067_v21  ;;  %v1066_v24 = vsub.f32 %v1034_v9, %v1055_v22  ;;  %v1300_v21 = vrot.slane %v1294_v19, %v4650_v37 }
 0x355   : > { %4360 = vpow2.f32 %v1072_v23  ;;  %v1070_v25 = vmul.f32 1.442695, %v1066_v24 }
 0x356   : > { %v1061_v26 = vpop.xlane.xlu1 %1060 }
 0x357   : > { %4362 = vpow2.f32 %v1070_v25  ;;  %v1068_v27 = vsub.f32 %v1044_v16, %v1061_v26  ;;  %v3835_v16 = vld [vmem:[%s5185_s6 + $0x28] sm:$0xff]  ;;  %v1457_v25 = vrot.slane %v1294_v19, %v4660_v41 }
 0x359   : > { %v1074_v28 = vmul.f32 1.442695, %v1068_v27 }
 0x35a   : > { %v1065_v29 = vpop.xlane.xlu1 %1064 }
 0x35b   : > { %4364 = vpow2.f32 %v1074_v28  ;;  %v1069_v30 = vsub.f32 %v1049_v17, %v1065_v29 }
 0x35d   : > { %v1076_v31 = vmul.f32 1.442695, %v1069_v30  ;;  %v3842_v30 = vld [vmem:[%s5185_s6 + $0x38] sm:$0xff] }
 0x35f   : > { %4366 = vpow2.f32 %v1076_v31 }
 0x362   : > { %v4361_v36 = vpop.eup %4360 }
 0x363   : > { %v1081_v40 = vsel %vm1052_vm7, %v4361_v36, 0.0 }
 0x364   : > { %v4363_v42 = vpop.eup %4362  ;;  %1082 = vadd.xlane.f32.xlu1 %v1081_v40  ;;  %v3841_v40 = vld [vmem:[%s5185_s6 + $0x30] sm:$0xff] }
 0x365   : > { %v1078_v43 = vsel %vm1052_vm7, %v4363_v42, 0.0 }
 0x368   : > { %v4365_v44 = vpop.eup %4364  ;;  %1079 = vadd.xlane.f32.xlu1 %v1078_v43  ;;  %v3847_v43 = vld [vmem:[%s5185_s6 + $0x50] sm:$0xff] }
 0x369   : > { %v1084_v45 = vsel %vm1052_vm7, %v4365_v44, 0.0 }
 0x36c   : > { %v4367_v46 = vpop.eup %4366  ;;  %1085 = vadd.xlane.f32.xlu1 %v1084_v45 }
 0x36d   : > { %v1087_v47 = vsel %vm1062_vm8, %v4367_v46, 0.0 }
 0x370   : > { %1088 = vadd.xlane.f32.xlu1 %v1087_v47 }
 0x3ed   : > { %v1083_v48 = vpop.xlane.xlu1 %1082 }
 0x3ee   : > { %4368 = vrcp.f32 %v1083_v48  ;;  %v3840_v48 = vld [vmem:[%s5186_s7 + $0x4] sm:$0x7] }
 0x3f1   : > { %v1080_v50 = vpop.xlane.xlu1 %1079 }
 0x3f2   : > { %4370 = vrcp.f32 %v1080_v50 }
 0x3f5   : > { %v1086_v51 = vpop.xlane.xlu1 %1085 }
 0x3f6   : > { %4372 = vrcp.f32 %v1086_v51  ;;  %v1852_v51 = vrot.slane %v3840_v48, %v4660_v41 }
 0x3f9   : > { %v1089_v52 = vpop.xlane.xlu1 %1088 }
 0x3fa   : > { %4374 = vrcp.f32 %v1089_v52 }
 0x3fb   : > { %v4369_v53 = vpop.eup %4368 }
 0x3fc   : > { %v1093_v56 = vmul.f32 %v4369_v53, %v4361_v36 }
 0x3ff   : > { %v4371_v54 = vpop.eup %4370 }
 0x400   : > { %v1091_v55 = vmul.f32 %v4371_v54, %v4363_v42  ;;  %v3848_v42 = vld [vmem:[%s5185_s6 + $0x58] sm:$0xff] }
 0x402   : > { %4091 = vmatprep.mubr.msk.f32.mxu1 %vm1052_vm7, %v1091_v55 }
 0x403   : > { %v4373_v57 = vpop.eup %4372  ;;  %4092 = vmatmul.mubr.msk.f32.vlgmr.msra.gmra.mxu1 %vm1052_vm7, %v1093_v56 }
 0x404   : > { %v1095_v58 = vmul.f32 %v4373_v57, %v4365_v44 }
 0x406   : > { %4094 = vmatprep.mubr.msk.f32.mxu1 %vm1052_vm7, %v1095_v58 }
 0x407   : > { %v4375_v59 = vpop.eup %4374 }
 0x408   : > { %v1097_v60 = vmul.f32 %v4375_v59, %v4367_v46 }
 0x40a   : > { %4095 = vmatmul.mubr.msk.f32.gmra.mxu1 %vm1052_vm7, %v1097_v60 }
 0x40b   : > { %4105 = vmatprep.mubr.msk.f32.mxu1 %vm4473_vm9, %v4472_v61 }
 0x4c3   : > { %v4093_v63 = vpop.f32.mrf.mxu1 }
 0x4c4   : > { %v1203_v6 = vmul.f32 %v4093_v63, %v1201_v2 }
 0x4c5   : > { %v1179_v1 = vpop.f32.mrf.mxu1 }
 0x4c6   : > { %v1202_v9 = vmul.f32 %v1201_v2, %v1179_v1  ;;  %v1207_v11 = vadd.f32 %v4641_v32, %v1203_v6  ;;  %v1296_v32 = vld [vmem:[%s5185_s6 + $0x8] sm:$0xff] }
 0x4c8   : > { %v1206_v38 = vadd.f32 %v1202_v9, %v4645_v34  ;;  %v3831_v34 = vld [vmem:[%s5185_s6 + $0x10] sm:$0xff] }
 0x4c9   : > { %4118 = vmatpush3.msra.mxu0 %v3831_v34 }
 0x4ca   : > { %v4096_v3 = vpop.f32.mrf.mxu1  ;;  %4129 = vmatprep.subr.mxu0 %v4472_v61 }
 0x4cb   : > { %v1205_v4 = vmul.f32 %v4096_v3, %v1201_v2  ;;  %v3844_v3 = vld [vmem:[%s5185_s6 + $0x40] sm:$0xff] }
 0x4cc   : > { %v1189_v5 = vpop.f32.mrf.mxu1 }
 0x4cd   : > { %v1209_v7 = vadd.f32 %v4647_v35, %v1205_v4  ;;  %v1204_v8 = vmul.f32 %v1201_v2, %v1189_v5  ;;  %v1210_v35 = vld [vmem:[%s5183_s4] sm:$0x7f]  ;;  %v3845_v2 = vld [vmem:[%s5185_s6 + $0x48] sm:$0xff]  ;;  %v1775_v5 = vrot.slane %v3840_v48, %v4667_v49 }
 0x4cf   : > { %v1208_v10 = vadd.f32 %v1204_v8, %v4657_v39  ;;  %4098 = vmatpush3.msk.msra.mxu1 %vm498_vm0, %v1209_v7  ;;  %v1295_v39 = vld [vmem:[%s5185_s6] sm:$0xff]  ;;  %v1698_v7 = vrot.slane %v3840_v48, %v4650_v37 }
 0x4d0   : > { %4099 = vmatprep.subr.mxu1 %v4472_v61  ;;  %v2262_v48 = vld [vmem:[%s5189_s10] sm:$0xff] }
 0x4d1   : > { %4100 = vmatpush3.msra.mxu1 %v1208_v10 }
 0x4d2   : > { %4101 = vmatprep.subr.mxu1 %v4472_v61 }
 0x4d3   : > { %4102 = vmatpush3.msra.mxu1 %v1207_v11 }
 0x4d4   : > { %4103 = vmatprep.subr.mxu1 %v4472_v61 }
 0x4d5   : > { %4104 = vmatpush3.msra.mxu1 %v1206_v38 }
 0x4d6   : > { %4106 = vmatmul.mubr.msk.f32.vlgmr.msra.gmra.mxu1 %vm1052_vm7, %v1210_v35  ;;  %4108 = vmatprep.subr.mxu1 %v4472_v61 }
 0x4d7   : > { %4112 = vmatprep.mubr.msk.f32.mxu1 %vm4473_vm9, %v4472_v61  ;;  %4109 = vmatpush3.msra.mxu1 %v1296_v32 }
 0x4d8   : > { %4110 = vmatprep.subr.mxu1 %v4472_v61 }
 0x4d9   : > { %4111 = vmatpush3.msra.mxu1 %v1295_v39 }
 0x4da   : > { %4122 = vmatprep.subr.mxu1 %v4472_v61 }
 0x596   : > { %v1283_v12 = vpop.f32.mrf.mxu1 }
 0x597   : > { %v1289_v14 = vrot.slane %v1283_v12, 7 }
 0x598   : > { %v4107_v15 = vpop.f32.mrf.mxu1 }
 0x599   : > { %v4757_v17 = vsel %vm1291_vm10, %v1287_v13, %v1289_v14 }
 0x59a   : > { %4113 = vmatmul.mubr.msk.f32.vlgmr.msra.gmra.mxu1 %vm532_vm4, %v4757_v17  ;;  %4120 = vmatmul.mubr.msk.f32.vlgmr.msra.gmra.mxu0 %vm532_vm4, %v4757_v17 }
 0x59b   : > { %4123 = vmatpush3.msra.mxu1 %v3835_v16  ;;  %4126 = vmatprep.mubr.msk.f32.mxu1 %vm4473_vm9, %v4472_v61  ;;  %v3853_v16 = vld [vmem:[%s5187_s8 + $0x8] sm:$0xff] }
 0x59c   : > { %4124 = vmatprep.subr.mxu1 %v4472_v61  ;;  %4131 = vmatprep.mubr.msk.f32.mxu0 %vm4473_vm9, %v4472_v61 }
 0x59d   : > { %4125 = vmatpush3.msra.mxu1 %v3834_v18 }
 0x59e   : > { %4127 = vmatmul.mubr.msk.f32.vlgmr.msra.gmra.mxu1 %vm532_vm4, %v4757_v17  ;;  %4134 = vmatprep.subr.mxu1 %v4472_v61 }
 0x59f   : > { %4136 = vmatprep.mubr.msk.f32.mxu1 %vm4473_vm9, %v4472_v61 }
 0x65a   : > { %v1370_v22 = vpop.f32.mrf.mxu1  ;;  %v1447_v23 = vpop.f32.mrf.mxu0 }
 0x65b   : > { %v1448_v24 = vadd.f32 %v1447_v23, %v1380_v20  ;;  %v1371_v28 = vadd.f32 %v1370_v22, %v1300_v21  ;;  %v1689_v21 = vld [vmem:[%s5187_s8] sm:$0xff] }
 0x65c   : > { %v4114_v26 = vpop.f32.mrf.mxu1  ;;  %v4121_v27 = vpop.f32.mrf.mxu0 }
 0x65d   : > { %4130 = vmatpush3.xpose.msk.msra.mxu0 %vm528_vm2, %v1448_v24  ;;  %v4863_v26 = vld [vmem:[%s5188_s9] sm:$0x3f] }
 0x65e   : > { %v1524_v29 = vpop.f32.mrf.mxu1  ;;  %4139 = vmatprep.subr.mxu0 %v4472_v61  ;;  %v2235_v27 = vrot.slane %v4863_v26, %v4650_v37 }
 0x65f   : > { %v1525_v31 = vadd.f32 %v1524_v29, %v1457_v25 }
 0x660   : > { %v4128_v36 = vpop.f32.mrf.mxu1  ;;  %4132 = vmatmul.mubr.msk.f32.vlgmr.msra.gmra.mxu0 %vm528_vm2, %v1371_v28 }
 0x661   : > { %4135 = vmatpush3.msra.mxu1 %v1525_v31  ;;  %4140 = vmatpush3.msra.mxu0 %v3842_v30 }
 0x662   : > { %4141 = vmatprep.subr.mxu0 %v4472_v61  ;;  %4143 = vmatprep.mubr.msk.f32.mxu0 %vm4473_vm9, %v4472_v61 }
 0x663   : > { %4142 = vmatpush3.msra.mxu0 %v3841_v40  ;;  %4146 = vmatprep.subr.mxu1 %v4472_v61 }
 0x664   : > { %4144 = vmatmul.mubr.msk.f32.vlgmr.msra.gmra.mxu0 %vm532_vm4, %v4757_v17  ;;  %4153 = vmatprep.subr.mxu0 %v4472_v61 }
 0x665   : > { %4154 = vmatpush3.msra.mxu0 %v3848_v42  ;;  %4157 = vmatprep.mubr.msk.f32.mxu0 %vm4473_vm9, %v4472_v61 }
 0x666   : > { %4155 = vmatprep.subr.mxu0 %v4472_v61 }
 0x667   : > { %4156 = vmatpush3.msra.mxu0 %v3847_v43 }
 0x668   : > { %4158 = vmatmul.mubr.msk.f32.vlgmr.msra.gmra.mxu0 %vm532_vm4, %v4757_v17  ;;  %4165 = vmatprep.subr.mxu0 %v4472_v61 }
 0x669   : > { %4167 = vmatprep.mubr.msk.f32.mxu0 %vm4473_vm9, %v4472_v61 }
 0x720   : > { %v1600_v44 = vpop.f32.mrf.mxu0 }
 0x721   : > { %v1604_v45 = vmul.f32 0.35355338, %v1600_v44 }
 0x722   : > { %v4133_v46 = vpop.f32.mrf.mxu0 }
 0x723   : > { %v1605_v47 = vsel %vm528_vm2, %v1604_v45, -inf }
 0x724   : > { %1606 = vmax.xlane.f32.xlu1 %v1605_v47  ;;  %v1765_v50 = vpop.f32.mrf.mxu0  ;;  %v2263_v47 = vld [vmem:[%s5189_s10 + $0x8] sm:$0xff] }
 0x725   : > { %v1766_v11 = vadd.f32 %v1765_v50, %v1698_v7 }
 0x726   : > { %v4145_v52 = vpop.f32.mrf.mxu0 }
 0x727   : > { %v2255_v52 = vrot.slane %v4863_v26, %v4660_v41 }
 0x728   : > { %v1919_v53 = vpop.f32.mrf.mxu0 }
 0x729   : > { %v1920_v54 = vadd.f32 %v1919_v53, %v1852_v51 }
 0x72a   : > { %v4159_v55 = vpop.f32.mrf.mxu0 }
 0x72b   : > { %4166 = vmatpush3.msra.mxu0 %v1920_v54  ;;  %v2260_v55 = vrot.slane %v4863_v26, %v4720_v0 }
 0x72c   : > { %4175 = vmatprep.subr.mxu0 %v4472_v61 }
 0x7ad   : > { %v1607_v56 = vpop.xlane.xlu1 %1606 }
 0x7ae   : > { %v1608_v57 = vsub.f32 %v1604_v45, %v1607_v56 }
 0x7b0   : > { %v1609_v58 = vmul.f32 1.442695, %v1608_v57 }
 0x7b2   : > { %4376 = vpow2.f32 %v1609_v58  ;;  %v2360_v58 = vld [vmem:[%s5191_s12 + $0x38] sm:$0xff] }
 0x7bf   : > { %v4377_v59 = vpop.eup %4376 }
 0x7c0   : > { %v1611_v60 = vsel %vm528_vm2, %v4377_v59, 0.0 }
 0x7c1   : > { %1612 = vadd.xlane.f32.xlu1 %v1611_v60  ;;  %v2358_v60 = vld [vmem:[%s5191_s12 + $0x28] sm:$0xff] }
 0x84a   : > { %v1613_v62 = vpop.xlane.xlu1 %1612 }
 0x84b   : > { %4378 = vrcp.f32 %v1613_v62  ;;  %v2357_v62 = vld [vmem:[%s5191_s12 + $0x20] sm:$0xff] }
 0x858   : > { %v4379_v63 = vpop.eup %4378 }
 0x859   : > { %v1615_v1 = vmul.f32 %v4379_v63, %v4377_v59  ;;  %v2359_v59 = vld [vmem:[%s5191_s12 + $0x30] sm:$0xff]  ;;  %v2356_v63 = vld [vmem:[%s5191_s12 + $0x18] sm:$0xff] }
 0x85b   : > { %4137 = vmatmul.mubr.msk.f32.vlgmr.msra.gmra.mxu1 %vm528_vm2, %v1615_v1  ;;  %v2355_v1 = vld [vmem:[%s5191_s12 + $0x10] sm:$0xff] }
 0x85c   : > { %4147 = vmatpush3.msra.mxu1 %v3845_v2  ;;  %4150 = vmatprep.mubr.msk.f32.mxu1 %vm4473_vm9, %v4472_v61  ;;  %v2354_v2 = vld [vmem:[%s5191_s12 + $0x8] sm:$0xff] }
 0x85d   : > { %4148 = vmatprep.subr.mxu1 %v4472_v61 }
 0x85e   : > { %4149 = vmatpush3.msra.mxu1 %v3844_v3  ;;  %v2353_v3 = vld [vmem:[%s5191_s12] sm:$0xff] }
 0x85f   : > { %4151 = vmatmul.mubr.msk.f32.vlgmr.msra.gmra.mxu1 %vm532_vm4, %v4757_v17  ;;  %4160 = vmatprep.subr.mxu1 %v4472_v61 }
 0x860   : > { %4162 = vmatprep.mubr.msk.f32.mxu1 %vm4473_vm9, %v4472_v61 }
 0x91b   : > { %v1685_v4 = vpop.f32.mrf.mxu1 }
 0x91d   : > { %v4138_v6 = vpop.f32.mrf.mxu1 }
 0x91f   : > { %v1842_v8 = vpop.f32.mrf.mxu1 }
 0x920   : > { %v1843_v9 = vadd.f32 %v1842_v8, %v1775_v5 }
 0x921   : > { %v4152_v10 = vpop.f32.mrf.mxu1 }
 0x922   : > { %4161 = vmatpush3.xpose.msk.msra.mxu1 %vm528_vm2, %v1843_v9 }
 0x923   : > { %4170 = vmatprep.subr.mxu1 %v4472_v61 }
 0x925   : > { %4163 = vmatmul.mubr.msk.f32.vlgmr.msra.gmra.mxu1 %vm528_vm2, %v1766_v11 }
 0x926   : > { %4172 = vmatprep.mubr.msk.f32.mxu1 %vm4473_vm9, %v4472_v61  ;;  %4171 = vmatpush3.msra.mxu1 %v3853_v16 }
 0x927   : > { %4180 = vmatprep.subr.mxu1 %v4472_v61 }
 0x9e5   : > { %v1995_v38 = vpop.f32.mrf.mxu1 }
 0x9e6   : > { %v1999_v35 = vmul.f32 0.35355338, %v1995_v38 }
 0x9e7   : > { %v4164_v32 = vpop.f32.mrf.mxu1 }
 0x9e8   : > { %v2000_v34 = vsel %vm528_vm2, %v1999_v35, -inf }
 0x9e9   : > { %2001 = vmax.xlane.f32.xlu1 %v2000_v34 }
 0xa72   : > { %v2002_v39 = vpop.xlane.xlu1 %2001 }
 0xa73   : > { %v2003_v12 = vsub.f32 %v1999_v35, %v2002_v39 }
 0xa75   : > { %v2004_v13 = vmul.f32 1.442695, %v2003_v12  ;;  %v2364_v12 = vrot.slane %v4863_v26, %v4667_v49 }
 0xa77   : > { %4380 = vpow2.f32 %v2004_v13 }
 0xa84   : > { %v4381_v14 = vpop.eup %4380 }
 0xa85   : > { %v2006_v15 = vsel %vm528_vm2, %v4381_v14, 0.0 }
 0xa86   : > { %2007 = vadd.xlane.f32.xlu1 %v2006_v15 }
 0xb0f   : > { %v2008_v18 = vpop.xlane.xlu1 %2007 }
 0xb10   : > { %4382 = vrcp.f32 %v2008_v18 }
 0xb1d   : > { %v4383_v19 = vpop.eup %4382 }
 0xb1e   : > { %v2010_v20 = vmul.f32 %v4383_v19, %v4381_v14 }
 0xb20   : > { %4168 = vmatmul.mubr.msk.f32.vlgmr.msra.gmra.mxu0 %vm528_vm2, %v2010_v20 }
 0xb21   : > { %4176 = vmatpush3.msra.mxu0 %v1689_v21  ;;  %4177 = vmatprep.mubr.msk.f32.mxu0 %vm4473_vm9, %v4472_v61 }
 0xb22   : > { %4187 = vmatprep.subr.mxu0 %v4472_v61 }
 0xb24   : > { %4178 = vmatmul.mubr.msk.f32.vlgmr.msra.gmra.mxu0 %vm528_vm2, %v1685_v4  ;;  %v3856_v4 = vld [vmem:[%s5190_s11] ss:$0 sm:$0xff] }
 0xb25   : > { %4203 = vmatprep.mubr.msk.f32.mxu0 %vm4473_vm9, %v4472_v61  ;;  %4188 = vmatpush3.msra.mxu0 %v2360_v58 }
 0xb26   : > { %4189 = vmatprep.subr.mxu0 %v4472_v61 }
 0xb27   : > { %4190 = vmatpush3.msra.mxu0 %v2359_v59 }
 0xb28   : > { %4191 = vmatprep.subr.mxu0 %v4472_v61 }
 0xb29   : > { %4192 = vmatpush3.msra.mxu0 %v2358_v60  ;;  %v3876_v60 = vld [vmem:[%s5185_s6 + $0x98] sm:$0xff] }
 0xb2a   : > { %4193 = vmatprep.subr.mxu0 %v4472_v61 }
 0xb2b   : > { %4194 = vmatpush3.msra.mxu0 %v2357_v62 }
 0xb2c   : > { %4195 = vmatprep.subr.mxu0 %v4472_v61 }
 0xb2d   : > { %4196 = vmatpush3.msra.mxu0 %v2356_v63 }
 0xb2e   : > { %4197 = vmatprep.subr.mxu0 %v4472_v61 }
 0xb2f   : > { %4198 = vmatpush3.msra.mxu0 %v2355_v1  ;;  %v3875_v1 = vld [vmem:[%s5185_s6 + $0x90] sm:$0xff] }
 0xb30   : > { %4199 = vmatprep.subr.mxu0 %v4472_v61 }
 0xb31   : > { %4200 = vmatpush3.msra.mxu0 %v2354_v2  ;;  %v3882_v2 = vld [vmem:[%s5185_s6 + $0xb8] sm:$0xff] }
 0xb32   : > { %4201 = vmatprep.subr.mxu0 %v4472_v61 }
 0xb33   : > { %4202 = vmatpush3.msra.mxu0 %v2353_v3  ;;  %v3881_v3 = vld [vmem:[%s5185_s6 + $0xb0] sm:$0xff] }
 0xb34   : > { %4232 = vmatprep.subr.mxu0 %v4472_v61 }
 0xbe0   : > { %v2080_v22 = vpop.f32.mrf.mxu0 }
 0xbe1   : > { %4173 = vmatmul.mubr.msk.f32.vlgmr.msra.gmra.mxu1 %vm528_vm2, %v2080_v22 }
 0xbe2   : > { %v4169_v23 = vpop.f32.mrf.mxu0  ;;  %4184 = vmatprep.mubr.msk.f32.mxu1 %vm4473_vm9, %v4472_v61  ;;  %4181 = vmatpush3.msra.mxu1 %v2263_v47  ;;  %v3864_v47 = vld [vmem:[%s5185_s6 + $0x70] sm:$0xff] }
 0xbe3   : > { %4182 = vmatprep.subr.mxu1 %v4472_v61 }
 0xbe4   : > { %v2228_v24 = vpop.f32.mrf.mxu0  ;;  %4183 = vmatpush3.msra.mxu1 %v2262_v48  ;;  %v3867_v48 = vld [vmem:[%s5185_s6 + $0x80] sm:$0xff] }
 0xbe5   : > { %4206 = vmatprep.subr.mxu1 %v4472_v61 }
 0xbe6   : > { %v4179_v25 = vpop.f32.mrf.mxu0 }
 0xbe7   : > { %v3861_v25 = vld [vmem:[%s5185_s6 + $0x60] sm:$0xff] }
 0xca1   : > { %v2155_v28 = vpop.f32.mrf.mxu1 }
 0xca2   : > { %v2229_v29 = vadd.f32 %v2228_v24, %v2155_v28  ;;  %v3862_v24 = vld [vmem:[%s5185_s6 + $0x68] sm:$0xff] }
 0xca3   : > { %v4174_v30 = vpop.f32.mrf.mxu1 }
 0xca4   : > { %v2236_v31 = vadd.f32 %v2235_v27, %v2229_v29  ;;  %v2455_v30 = vsub.s32 4, %v4643_v33 }
 0xca6   : > { %v2237_v36 = vadd.f32 %v2236_v31, %v4757_v17  ;;  %v2460_v31 = vsub.s32 5, %v4643_v33  ;;  %v3649_v33 = vld [vmem:[%s5193_s14] sm:$0x1] }
 0xca8   : > { %v2238_v40 = vsel %vm532_vm4, %v2237_v36, 0.0 }
 0xca9   : > { %2239 = vadd.xlane.f32.xlu1 %v2238_v40 }
 0xd32   : > { %v2240_v42 = vpop.xlane.xlu1 %2239 }
 0xd33   : > { %v2242_v43 = vmul.f32 0.0625, %v2240_v42  ;;  %v2461_v42 = vrot.slane %v4863_v26, %v2460_v31 }
 0xd35   : > { %v2243_v44 = vsub.f32 %v2237_v36, %v2242_v43  ;;  %v2456_v36 = vrot.slane %v4863_v26, %v2455_v30  ;;  %v3868_v26 = vld [vmem:[%s5185_s6 + $0x88] sm:$0xff] }
 0xd37   : > { %v2244_v45 = vmul.f32 %v2243_v44, %v2243_v44 }
 0xd39   : > { %v2245_v46 = vsel %vm532_vm4, %v2244_v45, 0.0 }
 0xd3a   : > { %2246 = vadd.xlane.f32.xlu1 %v2245_v46  ;;  %v3865_v46 = vld [vmem:[%s5185_s6 + $0x78] sm:$0xff] }
 0xdc3   : > { %v2247_v17 = vpop.xlane.xlu1 %2246 }
 0xdc4   : > { %v2248_v50 = vmul.f32 0.0625, %v2247_v17  ;;  %v3860_v17 = vld [vmem:[%s5186_s7 + $0x8] sm:$0x7] }
 0xdc6   : > { %v2249_v51 = vadd.f32 1e-05, %v2248_v50 }
 0xdc8   : > { %4384 = vrsqrt.f32 %v2249_v51  ;;  %v2553_v51 = vrot.slane %v3860_v17, %v4667_v49 }
 0xdd5   : > { %v4385_v53 = vpop.eup %4384 }
 0xdd6   : > { %v2251_v54 = vmul.f32 %v4385_v53, %v2243_v44  ;;  %v2473_v53 = vrot.slane %v3860_v17, %v4650_v37 }
 0xdd8   : > { %v2256_v56 = vmul.f32 %v2255_v52, %v2251_v54 }
 0xdda   : > { %v2261_v57 = vadd.f32 %v2260_v55, %v2256_v56  ;;  %v2630_v56 = vrot.slane %v3860_v17, %v4660_v41  ;;  %v3887_v17 = vld [vmem:[%s5187_s8 + $0x18] sm:$0xff] }
 0xddc   : > { %4185 = vmatmul.mubr.msk.f32.vlgmr.msra.gmra.mxu1 %vm532_vm4, %v2261_v57 }
 0xddd   : > { %4210 = vmatprep.mubr.msk.f32.mxu1 %vm4473_vm9, %v4472_v61  ;;  %4207 = vmatpush3.msra.mxu1 %v3862_v24 }
 0xdde   : > { %4208 = vmatprep.subr.mxu1 %v4472_v61 }
 0xddf   : > { %4209 = vmatpush3.msra.mxu1 %v3861_v25 }
 0xde0   : > { %4213 = vmatprep.subr.mxu1 %v4472_v61 }
 0xe9c   : > { %v2340_v5 = vpop.f32.mrf.mxu1 }
 0xe9d   : > { %v2341_v6 = vadd.f32 %v3856_v4, %v2340_v5 }
 0xe9e   : > { %v4186_v7 = vpop.f32.mrf.mxu1 }
 0xe9f   : > { %v2344_v8 = vmul.f32 %v2341_v6, %v2341_v6 }
 0xea1   : > { %v2345_v9 = vmul.f32 %v2344_v8, %v2341_v6  ;;  %v3874_v8 = vld [vmem:[%s5186_s7 + $0xc] sm:$0x7] }
 0xea2   : > { %v2872_v24 = vrot.slane %v3874_v8, %v4650_v37 }
 0xea3   : > { %v2346_v10 = vmul.f32 0.044715, %v2345_v9 }
 0xea5   : > { %v2347_v11 = vadd.f32 %v2346_v10, %v2341_v6  ;;  %v3026_v10 = vrot.slane %v3874_v8, %v4660_v41 }
 0xea7   : > { %v2348_v38 = vmul.f32 0.7978846, %v2347_v11 }
 0xea9   : > { %4386 = vtanh.f32 %v2348_v38 }
 0xeb6   : > { %v4387_v35 = vpop.eup %4386 }
 0xeb7   : > { %v2350_v32 = vadd.f32 1.0, %v4387_v35 }
 0xeb9   : > { %v2351_v34 = vmul.f32 0.5, %v2350_v32 }
 0xebb   : > { %v2352_v39 = vmul.f32 %v2351_v34, %v2341_v6 }
 0xebd   : > { %4204 = vmatmul.mubr.msk.f32.vlgmr.msra.gmra.mxu0 %vm2365_vm11, %v2352_v39 }
 0xebe   : > { %4234 = vmatprep.mubr.msk.f32.mxu0 %vm4473_vm9, %v4472_v61 }
 0xf7d   : > { %v2435_v13 = vpop.f32.mrf.mxu0 }
 0xf7e   : > { %v2436_v14 = vadd.f32 %v2435_v13, %v2364_v12 }
 0xf7f   : > { %v4205_v15 = vpop.f32.mrf.mxu0 }
 0xf80   : > { %v2439_v16 = vadd.f32 %v2436_v14, %v2261_v57 }
 0xf82   : > { %v2440_v18 = vsel %vm532_vm4, %v2439_v16, 0.0 }
 0xf83   : > { %2441 = vadd.xlane.f32.xlu1 %v2440_v18 }
0x100c   : > { %v2442_v19 = vpop.xlane.xlu1 %2441 }
0x100d   : > { %v2443_v20 = vmul.f32 0.0625, %v2442_v19  ;;  %v3879_v19 = vld [vmem:[%s5185_s6 + $0xa8] sm:$0xff] }
0x100f   : > { %v2444_v21 = vsub.f32 %v2439_v16, %v2443_v20  ;;  %v3878_v20 = vld [vmem:[%s5185_s6 + $0xa0] sm:$0xff] }
0x1011   : > { %v2445_v22 = vmul.f32 %v2444_v21, %v2444_v21 }
0x1013   : > { %v2446_v23 = vsel %vm532_vm4, %v2445_v22, 0.0  ;;  %v2949_v22 = vrot.slane %v3874_v8, %v4667_v49 }
0x1014   : > { %2447 = vadd.xlane.f32.xlu0 %v2446_v23 }
0x109d   : > { %v2448_v27 = vpop.xlane.xlu0 %2447 }
0x109e   : > { %v2449_v28 = vmul.f32 0.0625, %v2448_v27 }
0x10a0   : > { %v2450_v29 = vadd.f32 1e-05, %v2449_v28 }
0x10a2   : > { %4388 = vrsqrt.f32 %v2450_v29 }
0x10af   : > { %v4389_v40 = vpop.eup %4388 }
0x10b0   : > { %v2452_v43 = vmul.f32 %v4389_v40, %v2444_v21 }
0x10b2   : > { %v2457_v44 = vmul.f32 %v2456_v36, %v2452_v43 }
0x10b4   : > { %v4943_v45 = vadd.f32 %v2461_v42, %v2457_v44 }
0x10b6   : > { %4211 = vmatmul.mubr.msk.f32.vlgmr.msra.gmra.mxu1 %vm532_vm4, %v4943_v45 }
0x10b7   : > { %4214 = vmatpush3.msra.mxu1 %v3865_v46  ;;  %4217 = vmatprep.mubr.msk.f32.mxu1 %vm4473_vm9, %v4472_v61 }
0x10b8   : > { %4215 = vmatprep.subr.mxu1 %v4472_v61 }
0x10b9   : > { %4216 = vmatpush3.msra.mxu1 %v3864_v47 }
0x10ba   : > { %4218 = vmatmul.mubr.msk.f32.vlgmr.msra.gmra.mxu1 %vm532_vm4, %v4943_v45  ;;  %4220 = vmatprep.subr.mxu1 %v4472_v61 }
0x10bb   : > { %4221 = vmatpush3.msra.mxu1 %v3868_v26  ;;  %4224 = vmatprep.mubr.msk.f32.mxu1 %vm4473_vm9, %v4472_v61 }
0x10bc   : > { %4222 = vmatprep.subr.mxu1 %v4472_v61 }
0x10bd   : > { %4223 = vmatpush3.msra.mxu1 %v3867_v48 }
0x10be   : > { %4225 = vmatmul.mubr.msk.f32.vlgmr.msra.gmra.mxu1 %vm532_vm4, %v4943_v45  ;;  %4227 = vmatprep.subr.mxu1 %v4472_v61 }
0x10bf   : > { %4229 = vmatprep.mubr.msk.f32.mxu1 %vm4473_vm9, %v4472_v61 }
0x1176   : > { %v2543_v50 = vpop.f32.mrf.mxu1 }
0x1177   : > { %v2544_v58 = vadd.f32 %v2543_v50, %v2473_v53  ;;  %v3873_v53 = vld [vmem:[%s5187_s8 + $0x10] sm:$0xff] }
0x1178   : > { %v4212_v52 = vpop.f32.mrf.mxu1 }
0x117a   : > { %v2620_v54 = vpop.f32.mrf.mxu1 }
0x117b   : > { %v2621_v55 = vadd.f32 %v2620_v54, %v2553_v51 }
0x117c   : > { %v4219_v57 = vpop.f32.mrf.mxu1 }
0x117d   : > { %4228 = vmatpush3.xpose.msk.msra.mxu1 %vm528_vm2, %v2621_v55 }
0x117e   : > { %v2697_v59 = vpop.f32.mrf.mxu1  ;;  %4237 = vmatprep.subr.mxu1 %v4472_v61 }
0x117f   : > { %v2698_v62 = vadd.f32 %v2697_v59, %v2630_v56 }
0x1180   : > { %v4226_v63 = vpop.f32.mrf.mxu1  ;;  %4230 = vmatmul.mubr.msk.f32.vlgmr.msra.gmra.mxu1 %vm528_vm2, %v2544_v58  ;;  %v5060_v58 = vld [vmem:[%s5188_s9 + $0x8] sm:$0x3f] }
0x1181   : > { %4233 = vmatpush3.msra.mxu0 %v2698_v62  ;;  %4238 = vmatpush3.msra.mxu1 %v3876_v60  ;;  %v3409_v59 = vrot.slane %v5060_v58, %v4650_v37  ;;  %v3891_v37 = vld [vmem:[%s5189_s10 + $0x18] sm:$0xff] }
0x1182   : > { %4239 = vmatprep.subr.mxu1 %v4472_v61  ;;  %4241 = vmatprep.mubr.msk.f32.mxu1 %vm4473_vm9, %v4472_v61 }
0x1183   : > { %4240 = vmatpush3.msra.mxu1 %v3875_v1  ;;  %4244 = vmatprep.subr.mxu0 %v4472_v61 }
0x1184   : > { %4242 = vmatmul.mubr.msk.f32.vlgmr.msra.gmra.mxu1 %vm532_vm4, %v4943_v45  ;;  %4251 = vmatprep.subr.mxu1 %v4472_v61 }
0x1185   : > { %4252 = vmatpush3.msra.mxu1 %v3882_v2  ;;  %4255 = vmatprep.mubr.msk.f32.mxu1 %vm4473_vm9, %v4472_v61 }
0x1186   : > { %4253 = vmatprep.subr.mxu1 %v4472_v61 }
0x1187   : > { %4254 = vmatpush3.msra.mxu1 %v3881_v3 }
0x1188   : > { %4256 = vmatmul.mubr.msk.f32.vlgmr.msra.gmra.mxu1 %vm532_vm4, %v4943_v45  ;;  %4263 = vmatprep.subr.mxu1 %v4472_v61 }
0x1189   : > { %4265 = vmatprep.mubr.msk.f32.mxu1 %vm4473_vm9, %v4472_v61 }
0x1240   : > { %v2773_v4 = vpop.f32.mrf.mxu1 }
0x1241   : > { %v2777_v5 = vmul.f32 0.35355338, %v2773_v4 }
0x1242   : > { %v4231_v6 = vpop.f32.mrf.mxu1 }
0x1243   : > { %v2778_v7 = vsel %vm528_vm2, %v2777_v5, -inf }
0x1244   : > { %2779 = vmax.xlane.f32.xlu1 %v2778_v7  ;;  %v2939_v9 = vpop.f32.mrf.mxu1 }
0x1245   : > { %v2940_v29 = vadd.f32 %v2939_v9, %v2872_v24  ;;  %v3890_v9 = vld [vmem:[%s5189_s10 + $0x10] sm:$0xff] }
0x1246   : > { %v4243_v11 = vpop.f32.mrf.mxu1 }
0x1248   : > { %v3093_v38 = vpop.f32.mrf.mxu1 }
0x1249   : > { %v3094_v35 = vadd.f32 %v3093_v38, %v3026_v10  ;;  %v3428_v38 = vrot.slane %v5060_v58, %v4660_v41  ;;  %v3901_v41 = vld [vmem:[%s5191_s12 + $0x70] sm:$0xff] }
0x124a   : > { %v4257_v32 = vpop.f32.mrf.mxu1 }
0x124b   : > { %4264 = vmatpush3.msra.mxu1 %v3094_v35 }
0x124c   : > { %4273 = vmatprep.subr.mxu1 %v4472_v61 }
0x12cd   : > { %v2780_v34 = vpop.xlane.xlu1 %2779 }
0x12ce   : > { %v2781_v39 = vsub.f32 %v2777_v5, %v2780_v34  ;;  %v3433_v34 = vrot.slane %v5060_v58, %v4720_v0  ;;  %v3900_v0 = vld [vmem:[%s5191_s12 + $0x68] sm:$0xff] }
0x12d0   : > { %v2782_v12 = vmul.f32 1.442695, %v2781_v39 }
0x12d2   : > { %4390 = vpow2.f32 %v2782_v12 }
0x12df   : > { %v4391_v13 = vpop.eup %4390 }
0x12e0   : > { %v2784_v14 = vsel %vm528_vm2, %v4391_v13, 0.0 }
0x12e1   : > { %2785 = vadd.xlane.f32.xlu0 %v2784_v14  ;;  %v3899_v14 = vld [vmem:[%s5191_s12 + $0x60] sm:$0xff] }
0x136a   : > { %v2786_v15 = vpop.xlane.xlu0 %2785 }
0x136b   : > { %4392 = vrcp.f32 %v2786_v15  ;;  %v3898_v15 = vld [vmem:[%s5191_s12 + $0x58] sm:$0xff] }
0x1378   : > { %v4393_v16 = vpop.eup %4392 }
0x1379   : > { %v2788_v18 = vmul.f32 %v4393_v16, %v4391_v13  ;;  %v3902_v13 = vld [vmem:[%s5191_s12 + $0x78] sm:$0xff]  ;;  %v3897_v16 = vld [vmem:[%s5191_s12 + $0x50] sm:$0xff] }
0x137b   : > { %4235 = vmatmul.mubr.msk.f32.vlgmr.msra.gmra.mxu0 %vm528_vm2, %v2788_v18  ;;  %v3896_v18 = vld [vmem:[%s5191_s12 + $0x48] sm:$0xff] }
0x137c   : > { %4245 = vmatpush3.msra.mxu0 %v3879_v19  ;;  %4248 = vmatprep.mubr.msk.f32.mxu0 %vm4473_vm9, %v4472_v61  ;;  %v3895_v19 = vld [vmem:[%s5191_s12 + $0x40] sm:$0xff] }
0x137d   : > { %4246 = vmatprep.subr.mxu0 %v4472_v61 }
0x137e   : > { %4247 = vmatpush3.msra.mxu0 %v3878_v20  ;;  %v3893_v20 = vld [vmem:[%s5190_s11 + $0x1] ss:$0 sm:$0xff] }
0x137f   : > { %4249 = vmatmul.mubr.msk.f32.vlgmr.msra.gmra.mxu0 %vm532_vm4, %v4943_v45  ;;  %4258 = vmatprep.subr.mxu0 %v4472_v61 }
0x1380   : > { %4260 = vmatprep.mubr.msk.f32.mxu0 %vm4473_vm9, %v4472_v61 }
0x143b   : > { %v2858_v21 = vpop.f32.mrf.mxu0 }
0x143d   : > { %v4236_v23 = vpop.f32.mrf.mxu0 }
0x143f   : > { %v3016_v25 = vpop.f32.mrf.mxu0 }
0x1440   : > { %v3017_v27 = vadd.f32 %v3016_v25, %v2949_v22 }
0x1441   : > { %v4250_v28 = vpop.f32.mrf.mxu0 }
0x1442   : > { %4259 = vmatpush3.xpose.msk.msra.mxu0 %vm528_vm2, %v3017_v27 }
0x1443   : > { %4268 = vmatprep.subr.mxu0 %v4472_v61 }
0x1445   : > { %4261 = vmatmul.mubr.msk.f32.vlgmr.msra.gmra.mxu0 %vm528_vm2, %v2940_v29 }
0x1446   : > { %4270 = vmatprep.mubr.msk.f32.mxu0 %vm4473_vm9, %v4472_v61  ;;  %4269 = vmatpush3.msra.mxu0 %v3887_v17 }
0x1447   : > { %4278 = vmatprep.subr.mxu0 %v4472_v61 }
0x1505   : > { %v3169_v36 = vpop.f32.mrf.mxu0 }
0x1506   : > { %v3173_v40 = vmul.f32 0.35355338, %v3169_v36 }
0x1507   : > { %v4262_v42 = vpop.f32.mrf.mxu0 }
0x1508   : > { %v3174_v43 = vsel %vm528_vm2, %v3173_v40, -inf }
0x1509   : > { %3175 = vmax.xlane.f32.xlu1 %v3174_v43 }
0x1592   : > { %v3176_v44 = vpop.xlane.xlu1 %3175 }
0x1593   : > { %v3177_v46 = vsub.f32 %v3173_v40, %v3176_v44  ;;  %v3540_v44 = vrot.slane %v5060_v58, %v4667_v49  ;;  %v3647_v49 = vld [vmem:[%s5192_s13] sm:$0xff] }
0x1595   : > { %v3178_v47 = vmul.f32 1.442695, %v3177_v46 }
0x1597   : > { %4394 = vpow2.f32 %v3178_v47 }
0x15a4   : > { %v4395_v26 = vpop.eup %4394 }
0x15a5   : > { %v3180_v48 = vsel %vm528_vm2, %v4395_v26, 0.0 }
0x15a6   : > { %3181 = vadd.xlane.f32.xlu0 %v3180_v48 }
0x162f   : > { %v3182_v50 = vpop.xlane.xlu0 %3181 }
0x1630   : > { %4396 = vrcp.f32 %v3182_v50 }
0x163d   : > { %v4397_v51 = vpop.eup %4396 }
0x163e   : > { %v3184_v52 = vmul.f32 %v4397_v51, %v4395_v26 }
0x1640   : > { %4266 = vmatmul.mubr.msk.f32.vlgmr.msra.gmra.mxu1 %vm528_vm2, %v3184_v52 }
0x1641   : > { %4274 = vmatpush3.msra.mxu1 %v3873_v53  ;;  %4275 = vmatprep.mubr.msk.f32.mxu1 %vm4473_vm9, %v4472_v61 }
0x1642   : > { %4285 = vmatprep.subr.mxu1 %v4472_v61 }
0x1644   : > { %4276 = vmatmul.mubr.msk.f32.vlgmr.msra.gmra.mxu1 %vm528_vm2, %v2858_v21 }
0x1645   : > { %4301 = vmatprep.mubr.msk.f32.mxu1 %vm4473_vm9, %v4472_v61  ;;  %4286 = vmatpush3.msra.mxu1 %v3902_v13 }
0x1646   : > { %4287 = vmatprep.subr.mxu1 %v4472_v61 }
0x1647   : > { %4288 = vmatpush3.msra.mxu1 %v3901_v41 }
0x1648   : > { %4289 = vmatprep.subr.mxu1 %v4472_v61 }
0x1649   : > { %4290 = vmatpush3.msra.mxu1 %v3900_v0 }
0x164a   : > { %4291 = vmatprep.subr.mxu1 %v4472_v61 }
0x164b   : > { %4292 = vmatpush3.msra.mxu1 %v3899_v14 }
0x164c   : > { %4293 = vmatprep.subr.mxu1 %v4472_v61 }
0x164d   : > { %4294 = vmatpush3.msra.mxu1 %v3898_v15 }
0x164e   : > { %4295 = vmatprep.subr.mxu1 %v4472_v61 }
0x164f   : > { %4296 = vmatpush3.msra.mxu1 %v3897_v16 }
0x1650   : > { %4297 = vmatprep.subr.mxu1 %v4472_v61 }
0x1651   : > { %4298 = vmatpush3.msra.mxu1 %v3896_v18 }
0x1652   : > { %4299 = vmatprep.subr.mxu1 %v4472_v61 }
0x1653   : > { %4300 = vmatpush3.msra.mxu1 %v3895_v19 }
0x1700   : > { %v3254_v54 = vpop.f32.mrf.mxu1 }
0x1701   : > { %4271 = vmatmul.mubr.msk.f32.vlgmr.msra.gmra.mxu0 %vm528_vm2, %v3254_v54 }
0x1702   : > { %v4267_v55 = vpop.f32.mrf.mxu1  ;;  %4282 = vmatprep.mubr.msk.f32.mxu0 %vm4473_vm9, %v4472_v61  ;;  %4279 = vmatpush3.msra.mxu0 %v3891_v37 }
0x1703   : > { %4280 = vmatprep.subr.mxu0 %v4472_v61  ;;  %v3648_v55 = vld [vmem:[%s5192_s13 + $0x8] sm:$0xff] }
0x1704   : > { %v3402_v56 = vpop.f32.mrf.mxu1  ;;  %4281 = vmatpush3.msra.mxu0 %v3890_v9 }
0x1705   : > { %4304 = vmatprep.subr.mxu0 %v4472_v61 }
0x1706   : > { %v4277_v57 = vpop.f32.mrf.mxu1 }
0x17c1   : > { %v3329_v60 = vpop.f32.mrf.mxu0 }
0x17c2   : > { %v3403_v62 = vadd.f32 %v3402_v56, %v3329_v60  ;;  %v3631_v60 = vrot.slane %v5060_v58, %v2455_v30 }
0x17c3   : > { %v4272_v63 = vpop.f32.mrf.mxu0 }
0x17c4   : > { %v3410_v1 = vadd.f32 %v3409_v59, %v3403_v62  ;;  %v3636_v63 = vrot.slane %v5060_v58, %v2460_v31 }
0x17c6   : > { %v3411_v2 = vadd.f32 %v3410_v1, %v4943_v45 }
0x17c8   : > { %v3412_v3 = vsel %vm532_vm4, %v3411_v2, 0.0 }
0x17c9   : > { %3413 = vadd.xlane.f32.xlu1 %v3412_v3 }
0x1852   : > { %v3414_v4 = vpop.xlane.xlu1 %3413 }
0x1853   : > { %v3415_v5 = vmul.f32 0.0625, %v3414_v4 }
0x1855   : > { %v3416_v6 = vsub.f32 %v3411_v2, %v3415_v5 }
0x1857   : > { %v3417_v7 = vmul.f32 %v3416_v6, %v3416_v6 }
0x1859   : > { %v3418_v8 = vsel %vm532_vm4, %v3417_v7, 0.0 }
0x185a   : > { %3419 = vadd.xlane.f32.xlu0 %v3418_v8 }
0x18e3   : > { %v3420_v45 = vpop.xlane.xlu0 %3419 }
0x18e4   : > { %v3421_v10 = vmul.f32 0.0625, %v3420_v45 }
0x18e6   : > { %v3422_v11 = vadd.f32 1e-05, %v3421_v10 }
0x18e8   : > { %4398 = vrsqrt.f32 %v3422_v11 }
0x18f5   : > { %v4399_v35 = vpop.eup %4398 }
0x18f6   : > { %v3424_v32 = vmul.f32 %v4399_v35, %v3416_v6 }
0x18f8   : > { %v3429_v39 = vmul.f32 %v3428_v38, %v3424_v32 }
0x18fa   : > { %v3434_v12 = vadd.f32 %v3433_v34, %v3429_v39 }
0x18fc   : > { %4283 = vmatmul.mubr.msk.f32.vlgmr.msra.gmra.mxu0 %vm532_vm4, %v3434_v12 }
0x18fd   : > { %4308 = vmatprep.mubr.msk.f32.mxu0 %vm4473_vm9, %v4472_v61  ;;  %4305 = vmatpush3.msra.mxu0 %v3648_v55 }
0x18fe   : > { %4306 = vmatprep.subr.mxu0 %v4472_v61 }
0x18ff   : > { %4307 = vmatpush3.msra.mxu0 %v3647_v49 }
0x19bc   : > { %v3515_v21 = vpop.f32.mrf.mxu0 }
0x19bd   : > { %v3516_v22 = vadd.f32 %v3893_v20, %v3515_v21 }
0x19be   : > { %v4284_v23 = vpop.f32.mrf.mxu0 }
0x19bf   : > { %v3519_v24 = vmul.f32 %v3516_v22, %v3516_v22 }
0x19c1   : > { %v3520_v25 = vmul.f32 %v3519_v24, %v3516_v22 }
0x19c3   : > { %v3521_v27 = vmul.f32 0.044715, %v3520_v25 }
0x19c5   : > { %v3522_v28 = vadd.f32 %v3521_v27, %v3516_v22 }
0x19c7   : > { %v3523_v29 = vmul.f32 0.7978846, %v3522_v28 }
0x19c9   : > { %4400 = vtanh.f32 %v3523_v29 }
0x19d6   : > { %v4401_v36 = vpop.eup %4400 }
0x19d7   : > { %v3525_v40 = vadd.f32 1.0, %v4401_v36 }
0x19d9   : > { %v3526_v42 = vmul.f32 0.5, %v3525_v40 }
0x19db   : > { %v3527_v43 = vmul.f32 %v3526_v42, %v3516_v22 }
0x19dd   : > { %4302 = vmatmul.mubr.msk.f32.vlgmr.msra.gmra.mxu1 %vm2365_vm11, %v3527_v43 }
0x1a9d   : > { %v3610_v46 = vpop.f32.mrf.mxu1 }
0x1a9e   : > { %v3611_v47 = vadd.f32 %v3610_v46, %v3540_v44 }
0x1a9f   : > { %v4303_v26 = vpop.f32.mrf.mxu1 }
0x1aa0   : > { %v3614_v48 = vadd.f32 %v3611_v47, %v3434_v12 }
0x1aa2   : > { %v3615_v17 = vsel %vm532_vm4, %v3614_v48, 0.0 }
0x1aa3   : > { %3616 = vadd.xlane.f32.xlu1 %v3615_v17 }
0x1b2c   : > { %v3617_v50 = vpop.xlane.xlu1 %3616 }
0x1b2d   : > { %v3618_v51 = vmul.f32 0.0625, %v3617_v50 }
0x1b2f   : > { %v3619_v52 = vsub.f32 %v3614_v48, %v3618_v51 }
0x1b31   : > { %v3620_v53 = vmul.f32 %v3619_v52, %v3619_v52 }
0x1b33   : > { %v3621_v54 = vsel %vm532_vm4, %v3620_v53, 0.0 }
0x1b34   : > { %3622 = vadd.xlane.f32.xlu0 %v3621_v54 }
0x1bbd   : > { %v3623_v56 = vpop.xlane.xlu0 %3622 }
0x1bbe   : > { %v3624_v57 = vmul.f32 0.0625, %v3623_v56 }
0x1bc0   : > { %v3625_v59 = vadd.f32 1e-05, %v3624_v57 }
0x1bc2   : > { %4402 = vrsqrt.f32 %v3625_v59 }
0x1bcf   : > { %v4403_v62 = vpop.eup %4402 }
0x1bd0   : > { %v3627_v1 = vmul.f32 %v4403_v62, %v3619_v52 }
0x1bd2   : > { %v3632_v2 = vmul.f32 %v3631_v60, %v3627_v1 }
0x1bd4   : > { %v3637_v3 = vadd.f32 %v3636_v63, %v3632_v2 }
0x1bd6   : > { %v3638_v61 = vsel %vm532_vm4, %v3637_v3, 0.0 }
0x1bd7   : > { %v3639_v4 = vrot.slane %v3638_v61, 4 }
0x1bd9   : > { %v3640_v5 = vadd.f32 %v3639_v4, %v3638_v61 }
0x1bdb   : > { %v3641_v6 = vrot.slane %v3640_v5, 2 }
0x1bdd   : > { %v3642_v7 = vadd.f32 %v3641_v6, %v3640_v5 }
0x1bdf   : > { %v3643_v8 = vrot.slane %v3642_v7, 1 }
0x1be1   : > { %v3644_v37 = vadd.f32 %v3643_v8, %v3642_v7 }
0x1be3   : > { %v3646_v9 = vmul.f32 0.125, %v3644_v37 }
0x1be5   : > { %4309 = vmatmul.mubr.msk.f32.vlgmr.msra.gmra.mxu0 %vm532_vm4, %v3646_v9 }
0x1ca5   : > { %v3719_v30 = vpop.f32.mrf.mxu0 }
0x1ca6   : > { %v3720_v31 = vadd.f32 %v3719_v30, %v3649_v33 }
0x1ca7   : > { %v4310_v58 = vpop.f32.mrf.mxu0 }
0x1ca8   : > { %3724 = vst.msk [vmem:[%s486_s0] sm:$0x1] %vm3723_vm12, %v3720_v31 }
0x1ca9   : > { %4417 = shalt.err (!%p4414_p3)
}
0x1caa   : > { %s4418_s23 = scalar_lea.hbm %s5144_s1, 16  ;;  %s4422_s25 = scalar_lea.hbm %s5194_s15, 32 }
0x1cab   : > { %p4419_p4 = scmp.ne.s32.totalorder %s5144_s1, %s4418_s23  ;;  %p4423_p9 = scmp.lt.s32.totalorder %s5144_s1, %s5194_s15 }
0x1cac   : > { %p4424_p10 = scmp.lt.s32.totalorder %s4422_s25, %s4418_s23 }
0x1cad   : > { %p4420_p7 = pnand %p4419_p4, %p4593_p5 }
0x1cae   : > { %p4425_p11 = por %p4424_p10, %p4423_p9 }
0x1caf   : > { %p4421_p8 = pneg %p4420_p7 }
0x1cb1   : > { %p4426_p12 = pnand %p4425_p11, %p4421_p8 }
0x1cb3   : > { %4429 = shalt.err (!%p4426_p12)
}
0x1cb4   : > { %4313 = dma.vmem_to_hbm [thread:$0]  (%p4593_p5), %s3739_s27, 16, %s5144_s1, %s3726_s2  }
0x1cb5 PF: > { %p4319_p13 = scmp.ge.s32.totalorder %s4464_s21, 2  ;;  %s3750_s3 = sand.u32 1, %s4452_s18  }
0x1cb6   : > { %s3751_s16 = scalar_lea.sflag [#allocation3], %s3750_s3 }
0x1cb7   : > { %p4316_p0 = pnand %p4319_p13, %p4597_p6 }
0x1cb9   : > { %p4317_p1 = pneg %p4316_p0 }
0x1cbb   : > { %4447 = dma.done.wait (%p4317_p1), %s3751_s16, 16  }
0x1cbc   : > { %4449 = vsyncadd (%p4317_p1), %s3751_s16, 4294967280  ;;  %s5206_s17 = sld [smem:[#allocation5_spill]]  ;;  %p25_p2 = scmp.ge.s32.totalorder %s4580_s24, 4  }
0x1cbd   : > { %s5207_s18 = smov %s4456_s19  ;;  %s5208_s19 = smov %s4460_s20 }
0x1cbe   : > { %s5210_s21 = smov %s4580_s24  ;;  %27 = sbr.rel (!%p25_p2) target bundleno = 8 (0x8), region = 136 }
0x1cc2   : > { %s5209_s20 = smov %s5206_s17 }
0x1cc3   :  { %3755 = vsyncpa [#allocation3], 1 }
0x1cc4   :  { %3757 = vsyncpa [#allocation3 + $0x1], 1 }

</bundles_post_ra>
